<compile_context>
chip_gen: v7x
topology: tpu7x:2x2x1
jax: 0.10.0
libtpu: 0.0.40
codegen_flags: <defaults>
</compile_context>

<pallas_src>
import functools

import jax
import jax.numpy as jnp
from jax.experimental import pallas as pl
from jax.experimental.pallas import tpu as pltpu


def _round_up(x, m):
    return ((x + m - 1) // m) * m


def _cdiv(a, b):
    return (a + b - 1) // b


# ---------------------------------------------------------------------------
# Pallas kernel 1: matmul + bias (+ optional ReLU), M-tiled, single K/N block.
# ---------------------------------------------------------------------------
def _mm_bias_kernel(x_ref, w_ref, b_ref, o_ref, *, act):
    out = jnp.dot(x_ref[...], w_ref[...], preferred_element_type=jnp.float32)
    out = out + b_ref[...]                        # f32 epilogue (v5e-safe)
    if act == "relu":
        out = jnp.maximum(out, 0.0)
    o_ref[...] = out.astype(o_ref.dtype)


def pallas_matmul(x, w, b, act="none", out_dtype=jnp.bfloat16):
    """x: [M, K], w: [K, N] bf16 (pre-packed), b: [1, N] f32 -> [M, N]."""
    M, K = x.shape
    K2, N = w.shape
    assert K == K2 and b.shape == (1, N)
    if x.dtype != jnp.bfloat16:
        x = x.astype(jnp.bfloat16)

    # Tile M only; keep >=2 blocks when possible (v7x megacore) and the
    # double-buffered footprint far below v7x's 64 MiB VMEM.
    if M <= 8:
        tm = _round_up(M, 8)
    else:
        tm = min(1024, _round_up(_cdiv(M, 2), 8))
    while tm > 8 and 2 * tm * (2 * K + 4 * N) > 24 * 1024 * 1024:
        tm = max(8, _round_up(tm // 2, 8))

    return pl.pallas_call(
        functools.partial(_mm_bias_kernel, act=act),
        out_shape=jax.ShapeDtypeStruct((M, N), out_dtype),
        grid=(_cdiv(M, tm),),
        in_specs=[
            pl.BlockSpec((tm, K), lambda i: (i, 0)),
            pl.BlockSpec((K, N), lambda i: (0, 0)),   # weights stay resident
            pl.BlockSpec((1, N), lambda i: (0, 0)),
        ],
        out_specs=pl.BlockSpec((tm, N), lambda i: (i, 0)),
        compiler_params=pltpu.CompilerParams(
            dimension_semantics=("parallel",),
            vmem_limit_bytes=48 * 1024 * 1024),
    )(x, w, b)


# ---------------------------------------------------------------------------
# Pallas kernel 2: fused VectorQuantizer, tiled over rows.
# ---------------------------------------------------------------------------
def _vq_kernel(x_ref, e_ref, e2_ref, q_ref, sse_ref, cnt_ref, *, m_real):
    tm = x_ref.shape[0]
    E = e_ref.shape[0]

    x = x_ref[...]                                              # (tm, D) f32
    e = e_ref[...]                                              # (E, D)  f32

    x2 = jnp.sum(x * x, axis=1, keepdims=True)                  # (tm, 1)
    # Contract dim 1 of both operands (no explicit transpose of the codebook).
    xe = jax.lax.dot_general(x, e, (((1,), (1,)), ((), ())),
                             preferred_element_type=jnp.float32)  # (tm, E)
    dist = (x2 - 2.0 * xe) + e2_ref[...]                        # (tm, E)

    # argmin with first-index tie-breaking (matches torch.argmin).
    col = jax.lax.broadcasted_iota(jnp.int32, dist.shape, 1)
    dmin = jnp.min(dist, axis=1, keepdims=True)
    idx = jnp.min(jnp.where(dist <= dmin, col, E), axis=1, keepdims=True)
    enc = (col == idx).astype(jnp.float32)                      # (tm, E) one-hot

    q = jnp.dot(enc, e, preferred_element_type=jnp.float32)     # (tm, D)
    q_ref[...] = q

    # Rows past the real M (partial last block) hold unspecified data; select
    # them out so they cannot contaminate the partial reductions.
    row = jax.lax.broadcasted_iota(jnp.int32, (tm, 1), 0) + pl.program_id(0) * tm
    valid = row < m_real
    diff = jnp.where(valid, q - x, 0.0)
    sse_ref[...] = jnp.sum(diff * diff, axis=0).reshape(1, 1, -1)
    cnt_ref[...] = jnp.sum(jnp.where(valid, enc, 0.0), axis=0).reshape(1, 1, -1)


def pallas_vector_quantizer(flat_input, embedding, commitment_cost):
    """flat_input: [M, D], embedding: [E, D] -> (loss, quantized, perplexity)."""
    M, D = flat_input.shape
    E = embedding.shape[0]

    x = flat_input.astype(jnp.float32)
    e = embedding.astype(jnp.float32)
    e2 = jnp.sum(e * e, axis=1)[None, :]                         # (1, E), in glue

    if M <= 8:
        tm = _round_up(M, 8)
    else:
        tm = min(512, _round_up(_cdiv(M, 2), 8))
    T = _cdiv(M, tm)

    q, sse_part, cnt_part = pl.pallas_call(
        functools.partial(_vq_kernel, m_real=M),
        out_shape=(
            jax.ShapeDtypeStruct((M, D), jnp.float32),
            jax.ShapeDtypeStruct((T, 1, D), jnp.float32),
            jax.ShapeDtypeStruct((T, 1, E), jnp.float32),
        ),
        grid=(T,),
        in_specs=[
            pl.BlockSpec((tm, D), lambda i: (i, 0)),
            pl.BlockSpec((E, D), lambda i: (0, 0)),    # codebook stays resident
            pl.BlockSpec((1, E), lambda i: (0, 0)),
        ],
        out_specs=(
            pl.BlockSpec((tm, D), lambda i: (i, 0)),
            pl.BlockSpec((1, 1, D), lambda i: (i, 0, 0)),
            pl.BlockSpec((1, 1, E), lambda i: (i, 0, 0)),
        ),
        compiler_params=pltpu.CompilerParams(
            dimension_semantics=("parallel",),
            vmem_limit_bytes=48 * 1024 * 1024),
    )(x, e, e2)

    # Tiny scalar finalization in glue (keeps the grid axis fully parallel).
    sse = jnp.sum(sse_part)
    counts = jnp.sum(cnt_part, axis=(0, 1))
    mse = sse / jnp.float32(M * D)
    loss = (1.0 + commitment_cost) * mse     # q_latent_loss + beta * e_latent_loss
    avg = counts / jnp.float32(M)
    perplexity = jnp.exp(-jnp.sum(avg * jnp.log(avg + 1e-10)))
    return loss, q, perplexity


# ---------------------------------------------------------------------------
# Weight pre-packing (done once at init, not per forward call)
# ---------------------------------------------------------------------------
def _pack_conv_w(w):
    """PyTorch [Cout, Cin, kh, kw] -> [kh*kw*Cin, Cout] bf16 (im2col tap order)."""
    co, ci, kh, kw = w.shape
    return w.transpose(2, 3, 1, 0).reshape(kh * kw * ci, co).astype(jnp.bfloat16)


def _pack_convT_w(w):
    """PyTorch ConvTranspose weight [Cin, Cout, 4, 4] -> [4*Cin, 4*Cout] bf16.

    Sub-pixel decomposition of k=4/s=2/p=1: each output parity (r, s) is a
    stride-1 2x2 conv of the 1-padded input with taps (taps[r][di], taps[s][dj]),
    taps = ((3, 1), (2, 0)).  Blocks are emitted in (r, s) order
    [(1,1), (1,0), (0,1), (0,0)] so that the post-matmul interleave is a single
    transpose + reshape + crop (output row/col index = original index + 1).
    """
    ci, co, kh, kw = w.shape
    assert kh == 4 and kw == 4
    taps = ((3, 1), (2, 0))
    blocks = []
    for r in (1, 0):
        for s in (1, 0):
            kblk = jnp.stack(
                [jnp.stack([w[:, :, taps[r][di], taps[s][dj]] for dj in range(2)],
                           axis=0) for di in range(2)], axis=0)    # (2,2,Cin,Cout)
            blocks.append(kblk.reshape(4 * ci, co))
    return jnp.concatenate(blocks, axis=1).astype(jnp.bfloat16)


# ---------------------------------------------------------------------------
# Conv layers (NHWC glue + Pallas matmul)
# ---------------------------------------------------------------------------
def _im2col_nhwc(x, k, stride, pad):
    """x: [N, H, W, C] -> patches [N*Ho*Wo, k*k*C] ordered (kh, kw, C)."""
    N, H, W, C = x.shape
    if k == 1 and stride == 1 and pad == 0:
        return x.reshape(N * H * W, C), H, W
    xp = jnp.pad(x, ((0, 0), (pad, pad), (pad, pad), (0, 0))) if pad else x
    Ho = (H + 2 * pad - k) // stride + 1
    Wo = (W + 2 * pad - k) // stride + 1
    cols = []
    for i in range(k):
        for j in range(k):
            cols.append(xp[:, i:i + stride * Ho:stride,
                           j:j + stride * Wo:stride, :])           # (N, Ho, Wo, C)
    patches = jnp.concatenate(cols, axis=-1)                       # channels-last
    return patches.reshape(N * Ho * Wo, k * k * C), Ho, Wo


def conv2d_packed(x, wm, b, k, stride=1, pad=0, act="none", out_dtype=jnp.bfloat16):
    """NHWC Conv2d with pre-packed weight wm: [k*k*Cin, Cout] bf16, b: [1,Cout] f32."""
    if x.dtype != jnp.bfloat16:
        x = x.astype(jnp.bfloat16)                # cast before the k^2 replication
    N = x.shape[0]
    patches, Ho, Wo = _im2col_nhwc(x, k, stride, pad)
    out = pallas_matmul(patches, wm, b, act=act, out_dtype=out_dtype)
    return out.reshape(N, Ho, Wo, wm.shape[1])


def conv_transpose2d_packed(x, w_comb, b_comb, act="none", out_dtype=jnp.bfloat16):
    """NHWC ConvTranspose2d(kernel=4, stride=2, padding=1), pre-packed weights."""
    if x.dtype != jnp.bfloat16:
        x = x.astype(jnp.bfloat16)
    N, H, W, Cin = x.shape
    cout = w_comb.shape[1] // 4
    xp = jnp.pad(x, ((0, 0), (1, 1), (1, 1), (0, 0)))              # (N, H+2, W+2, Cin)
    patches, Ho1, Wo1 = _im2col_nhwc(xp, 2, 1, 0)                  # Ho1=H+1, Wo1=W+1
    out = pallas_matmul(patches, w_comb, b_comb, act=act, out_dtype=out_dtype)
    comb = out.reshape(N, Ho1, Wo1, 2, 2, cout)
    y = comb.transpose(0, 1, 3, 2, 4, 5).reshape(N, 2 * Ho1, 2 * Wo1, cout)
    return y[:, 1:2 * H + 1, 1:2 * W + 1, :]


# ---------------------------------------------------------------------------
# VQVAE model (parameters + forward)
# ---------------------------------------------------------------------------
def init_params(key, num_hiddens, num_residual_layers, num_residual_hiddens,
                num_embeddings, embedding_dim):
    keys = iter(jax.random.split(key, 64))
    nh, nrh = num_hiddens, num_residual_hiddens

    def conv_w(co, ci, k):
        return jax.random.normal(next(keys), (co, ci, k, k), jnp.float32) * 0.05

    def zeros_b(co):
        return jnp.zeros((1, co), jnp.float32)

    def res_stack():
        return [dict(w3=_pack_conv_w(conv_w(nrh, nh, 3)), b3=zeros_b(nrh),
                     w1=_pack_conv_w(conv_w(nh, nrh, 1)), b1=zeros_b(nh))
                for _ in range(num_residual_layers)]

    p = {}
    # Encoder
    p["enc_c1_w"] = _pack_conv_w(conv_w(nh // 2, 3, 4)); p["enc_c1_b"] = zeros_b(nh // 2)
    p["enc_c2_w"] = _pack_conv_w(conv_w(nh, nh // 2, 4)); p["enc_c2_b"] = zeros_b(nh)
    p["enc_c3_w"] = _pack_conv_w(conv_w(nh, nh, 3));      p["enc_c3_b"] = zeros_b(nh)
    p["enc_res"] = res_stack()
    # pre-VQ 1x1 conv
    p["pre_vq_w"] = _pack_conv_w(conv_w(embedding_dim, nh, 1))
    p["pre_vq_b"] = zeros_b(embedding_dim)
    # codebook (uniform(-1/E, 1/E) like the PyTorch init)
    p["embedding"] = jax.random.uniform(
        next(keys), (num_embeddings, embedding_dim), jnp.float32,
        minval=-1.0 / num_embeddings, maxval=1.0 / num_embeddings)
    # Decoder
    p["dec_c1_w"] = _pack_conv_w(conv_w(nh, embedding_dim, 3)); p["dec_c1_b"] = zeros_b(nh)
    p["dec_res"] = res_stack()
    p["dec_t1_w"] = _pack_convT_w(
        jax.random.normal(next(keys), (nh, nh // 2, 4, 4), jnp.float32) * 0.05)
    p["dec_t1_b"] = jnp.zeros((1, 4 * (nh // 2)), jnp.float32)
    p["dec_t2_w"] = _pack_convT_w(
        jax.random.normal(next(keys), (nh // 2, 3, 4, 4), jnp.float32) * 0.05)
    p["dec_t2_b"] = jnp.zeros((1, 4 * 3), jnp.float32)
    return p


def residual_stack(x, layers):
    for lyr in layers:
        h = jnp.maximum(x, 0.0)
        h = conv2d_packed(h, lyr["w3"], lyr["b3"], k=3, stride=1, pad=1, act="relu")
        h = conv2d_packed(h, lyr["w1"], lyr["b1"], k=1, stride=1, pad=0)
        x = x + h
    return jnp.maximum(x, 0.0)


def vqvae_forward(p, x_nchw, commitment_cost):
    x = jnp.transpose(x_nchw, (0, 2, 3, 1)).astype(jnp.bfloat16)   # NCHW -> NHWC once

    # ---- Encoder ----
    z = conv2d_packed(x, p["enc_c1_w"], p["enc_c1_b"], k=4, stride=2, pad=1, act="relu")
    z = conv2d_packed(z, p["enc_c2_w"], p["enc_c2_b"], k=4, stride=2, pad=1, act="relu")
    z = conv2d_packed(z, p["enc_c3_w"], p["enc_c3_b"], k=3, stride=1, pad=1)
    z = residual_stack(z, p["enc_res"])

    # ---- pre-VQ 1x1 conv (f32 output feeds the quantizer) ----
    z = conv2d_packed(z, p["pre_vq_w"], p["pre_vq_b"], k=1, stride=1, pad=0,
                      out_dtype=jnp.float32)

    # ---- VectorQuantizer (decay=0 branch) ----
    N, H, W, D = z.shape
    flat = z.reshape(N * H * W, D)
    loss, q_flat, perplexity = pallas_vector_quantizer(
        flat, p["embedding"], commitment_cost)
    quantized = q_flat.reshape(N, H, W, D)     # straight-through value == quantized

    # ---- Decoder ----
    d = conv2d_packed(quantized, p["dec_c1_w"], p["dec_c1_b"], k=3, stride=1, pad=1)
    d = residual_stack(d, p["dec_res"])
    d = conv_transpose2d_packed(d, p["dec_t1_w"], p["dec_t1_b"], act="relu")
    x_recon = conv_transpose2d_packed(d, p["dec_t2_w"], p["dec_t2_b"],
                                      out_dtype=jnp.float32)

    return loss, jnp.transpose(x_recon, (0, 3, 1, 2)), perplexity   # back to NCHW


if __name__ == "__main__":
    # small, deterministic configuration
    num_hiddens = 32
    num_residual_layers = 2
    num_residual_hiddens = 8
    num_embeddings = 16
    embedding_dim = 8
    commitment_cost = 0.25

    key = jax.random.PRNGKey(0)
    k_params, k_x = jax.random.split(key)
    params = init_params(k_params, num_hiddens, num_residual_layers,
                         num_residual_hiddens, num_embeddings, embedding_dim)
    x = jax.random.normal(k_x, (2, 3, 16, 16), jnp.float32)    # NCHW input

    fwd = jax.jit(functools.partial(vqvae_forward,
                                    commitment_cost=commitment_cost))
    loss, x_recon, perplexity = fwd(params, x)
    jax.block_until_ready((loss, x_recon, perplexity))

    assert x_recon.shape == (2, 3, 16, 16)
    assert loss.shape == () and perplexity.shape == ()
    assert bool(jnp.all(jnp.isfinite(x_recon)))
    assert bool(jnp.isfinite(loss)) and bool(jnp.isfinite(perplexity))
    print("KERNEL_OK")
</pallas_src>

<mosaic_0001>
module attributes {stable_mosaic.version = 11 : i64} {
  func.func @_mm_bias_kernel(%arg0: i32, %arg1: memref<64x48xbf16, #tpu.memory_space<vmem>>, %arg2: memref<48x16xbf16, #tpu.memory_space<vmem>>, %arg3: memref<1x16xf32, #tpu.memory_space<vmem>>, %arg4: memref<64x16xbf16, #tpu.memory_space<vmem>>) attributes {dimension_semantics = [#tpu.dimension_semantics<parallel>], iteration_bounds = array<i64: 2>, scalar_prefetch = 0 : i64, scratch_operands = 0 : i64, tpu.core_type = #tpu.core_type<tc>, window_params = [{transform_indices = @transform_0, window_bounds = array<i64: 64, 48>}, {pipeline_mode = #tpu.pipeline_mode<synchronous>, transform_indices = @transform_1, window_bounds = array<i64: 48, 16>}, {pipeline_mode = #tpu.pipeline_mode<synchronous>, transform_indices = @transform_2, window_bounds = array<i64: 1, 16>}, {transform_indices = @transform_3, window_bounds = array<i64: 64, 16>}]} {
    %c0 = arith.constant 0 : index
    %c0_0 = arith.constant 0 : index
    %0 = vector.load %arg1[%c0, %c0_0] : memref<64x48xbf16, #tpu.memory_space<vmem>>, vector<64x48xbf16>
    %c0_1 = arith.constant 0 : index
    %c0_2 = arith.constant 0 : index
    %1 = vector.load %arg2[%c0_1, %c0_2] : memref<48x16xbf16, #tpu.memory_space<vmem>>, vector<48x16xbf16>
    %cst = arith.constant dense<0.000000e+00> : vector<64x16xf32>
    %2 = tpu.matmul %0, %1, %cst {dimension_numbers = #tpu.dot_dimension_numbers<[1], [0], [0], [1], [0, 0, 1, 1], [], []>} : vector<64x48xbf16>, vector<48x16xbf16>, vector<64x16xf32> -> vector<64x16xf32>
    %c0_3 = arith.constant 0 : index
    %c0_4 = arith.constant 0 : index
    %3 = vector.load %arg3[%c0_3, %c0_4] : memref<1x16xf32, #tpu.memory_space<vmem>>, vector<1x16xf32>
    %4 = vector.broadcast %3 : vector<1x16xf32> to vector<64x16xf32>
    %5 = arith.addf %2, %4 : vector<64x16xf32>
    %cst_5 = arith.constant 0.000000e+00 : f32
    %6 = vector.broadcast %cst_5 : f32 to vector<64x16xf32>
    %7 = arith.maximumf %5, %6 : vector<64x16xf32>
    %8 = arith.truncf %7 : vector<64x16xf32> to vector<64x16xbf16>
    %c0_6 = arith.constant 0 : index
    %c0_7 = arith.constant 0 : index
    %9 = vector.load %arg4[%c0_6, %c0_7] : memref<64x16xbf16, #tpu.memory_space<vmem>>, vector<64x16xbf16>
    tpu.vector_store %arg4[%c0_6, %c0_7], %8 {strides = array<i32>} : memref<64x16xbf16, #tpu.memory_space<vmem>>, vector<64x16xbf16>,
    return
  }
  func.func @transform_0(%arg0: i32) -> (i32, i32) {
    %c0_i32 = arith.constant 0 : i32
    %c0_i32_0 = arith.constant 0 : i32
    return %arg0, %c0_i32 : i32, i32
  }
  func.func @transform_1(%arg0: i32) -> (i32, i32) {
    %c0_i32 = arith.constant 0 : i32
    %c0_i32_0 = arith.constant 0 : i32
    %c0_i32_1 = arith.constant 0 : i32
    return %c0_i32, %c0_i32_0 : i32, i32
  }
  func.func @transform_2(%arg0: i32) -> (i32, i32) {
    %c0_i32 = arith.constant 0 : i32
    %c0_i32_0 = arith.constant 0 : i32
    %c0_i32_1 = arith.constant 0 : i32
    return %c0_i32, %c0_i32_0 : i32, i32
  }
  func.func @transform_3(%arg0: i32) -> (i32, i32) {
    %c0_i32 = arith.constant 0 : i32
    %c0_i32_0 = arith.constant 0 : i32
    return %arg0, %c0_i32 : i32, i32
  }
}

module attributes {stable_mosaic.version = 11 : i64} {
  func.func @_mm_bias_kernel(%arg0: i32, %arg1: memref<16x256xbf16, #tpu.memory_space<vmem>>, %arg2: memref<256x32xbf16, #tpu.memory_space<vmem>>, %arg3: memref<1x32xf32, #tpu.memory_space<vmem>>, %arg4: memref<16x32xbf16, #tpu.memory_space<vmem>>) attributes {dimension_semantics = [#tpu.dimension_semantics<parallel>], iteration_bounds = array<i64: 2>, scalar_prefetch = 0 : i64, scratch_operands = 0 : i64, tpu.core_type = #tpu.core_type<tc>, window_params = [{transform_indices = @transform_0, window_bounds = array<i64: 16, 256>}, {pipeline_mode = #tpu.pipeline_mode<synchronous>, transform_indices = @transform_1, window_bounds = array<i64: 256, 32>}, {pipeline_mode = #tpu.pipeline_mode<synchronous>, transform_indices = @transform_2, window_bounds = array<i64: 1, 32>}, {transform_indices = @transform_3, window_bounds = array<i64: 16, 32>}]} {
    %c0 = arith.constant 0 : index
    %c0_0 = arith.constant 0 : index
    %0 = vector.load %arg1[%c0, %c0_0] : memref<16x256xbf16, #tpu.memory_space<vmem>>, vector<16x256xbf16>
    %c0_1 = arith.constant 0 : index
    %c0_2 = arith.constant 0 : index
    %1 = vector.load %arg2[%c0_1, %c0_2] : memref<256x32xbf16, #tpu.memory_space<vmem>>, vector<256x32xbf16>
    %cst = arith.constant dense<0.000000e+00> : vector<16x32xf32>
    %2 = tpu.matmul %0, %1, %cst {dimension_numbers = #tpu.dot_dimension_numbers<[1], [0], [0], [1], [0, 0, 1, 1], [], []>} : vector<16x256xbf16>, vector<256x32xbf16>, vector<16x32xf32> -> vector<16x32xf32>
    %c0_3 = arith.constant 0 : index
    %c0_4 = arith.constant 0 : index
    %3 = vector.load %arg3[%c0_3, %c0_4] : memref<1x32xf32, #tpu.memory_space<vmem>>, vector<1x32xf32>
    %4 = vector.broadcast %3 : vector<1x32xf32> to vector<16x32xf32>
    %5 = arith.addf %2, %4 : vector<16x32xf32>
    %cst_5 = arith.constant 0.000000e+00 : f32
    %6 = vector.broadcast %cst_5 : f32 to vector<16x32xf32>
    %7 = arith.maximumf %5, %6 : vector<16x32xf32>
    %8 = arith.truncf %7 : vector<16x32xf32> to vector<16x32xbf16>
    %c0_6 = arith.constant 0 : index
    %c0_7 = arith.constant 0 : index
    %9 = vector.load %arg4[%c0_6, %c0_7] : memref<16x32xbf16, #tpu.memory_space<vmem>>, vector<16x32xbf16>
    tpu.vector_store %arg4[%c0_6, %c0_7], %8 {strides = array<i32>} : memref<16x32xbf16, #tpu.memory_space<vmem>>, vector<16x32xbf16>,
    return
  }
  func.func @transform_0(%arg0: i32) -> (i32, i32) {
    %c0_i32 = arith.constant 0 : i32
    %c0_i32_0 = arith.constant 0 : i32
    return %arg0, %c0_i32 : i32, i32
  }
  func.func @transform_1(%arg0: i32) -> (i32, i32) {
    %c0_i32 = arith.constant 0 : i32
    %c0_i32_0 = arith.constant 0 : i32
    %c0_i32_1 = arith.constant 0 : i32
    return %c0_i32, %c0_i32_0 : i32, i32
  }
  func.func @transform_2(%arg0: i32) -> (i32, i32) {
    %c0_i32 = arith.constant 0 : i32
    %c0_i32_0 = arith.constant 0 : i32
    %c0_i32_1 = arith.constant 0 : i32
    return %c0_i32, %c0_i32_0 : i32, i32
  }
  func.func @transform_3(%arg0: i32) -> (i32, i32) {
    %c0_i32 = arith.constant 0 : i32
    %c0_i32_0 = arith.constant 0 : i32
    return %arg0, %c0_i32 : i32, i32
  }
}

module attributes {stable_mosaic.version = 11 : i64} {
  func.func @_mm_bias_kernel(%arg0: i32, %arg1: memref<16x288xbf16, #tpu.memory_space<vmem>>, %arg2: memref<288x32xbf16, #tpu.memory_space<vmem>>, %arg3: memref<1x32xf32, #tpu.memory_space<vmem>>, %arg4: memref<16x32xbf16, #tpu.memory_space<vmem>>) attributes {dimension_semantics = [#tpu.dimension_semantics<parallel>], iteration_bounds = array<i64: 2>, scalar_prefetch = 0 : i64, scratch_operands = 0 : i64, tpu.core_type = #tpu.core_type<tc>, window_params = [{transform_indices = @transform_0, window_bounds = array<i64: 16, 288>}, {pipeline_mode = #tpu.pipeline_mode<synchronous>, transform_indices = @transform_1, window_bounds = array<i64: 288, 32>}, {pipeline_mode = #tpu.pipeline_mode<synchronous>, transform_indices = @transform_2, window_bounds = array<i64: 1, 32>}, {transform_indices = @transform_3, window_bounds = array<i64: 16, 32>}]} {
    %c0 = arith.constant 0 : index
    %c0_0 = arith.constant 0 : index
    %0 = vector.load %arg1[%c0, %c0_0] : memref<16x288xbf16, #tpu.memory_space<vmem>>, vector<16x288xbf16>
    %c0_1 = arith.constant 0 : index
    %c0_2 = arith.constant 0 : index
    %1 = vector.load %arg2[%c0_1, %c0_2] : memref<288x32xbf16, #tpu.memory_space<vmem>>, vector<288x32xbf16>
    %cst = arith.constant dense<0.000000e+00> : vector<16x32xf32>
    %2 = tpu.matmul %0, %1, %cst {dimension_numbers = #tpu.dot_dimension_numbers<[1], [0], [0], [1], [0, 0, 1, 1], [], []>} : vector<16x288xbf16>, vector<288x32xbf16>, vector<16x32xf32> -> vector<16x32xf32>
    %c0_3 = arith.constant 0 : index
    %c0_4 = arith.constant 0 : index
    %3 = vector.load %arg3[%c0_3, %c0_4] : memref<1x32xf32, #tpu.memory_space<vmem>>, vector<1x32xf32>
    %4 = vector.broadcast %3 : vector<1x32xf32> to vector<16x32xf32>
    %5 = arith.addf %2, %4 : vector<16x32xf32>
    %6 = arith.truncf %5 : vector<16x32xf32> to vector<16x32xbf16>
    %c0_5 = arith.constant 0 : index
    %c0_6 = arith.constant 0 : index
    %7 = vector.load %arg4[%c0_5, %c0_6] : memref<16x32xbf16, #tpu.memory_space<vmem>>, vector<16x32xbf16>
    tpu.vector_store %arg4[%c0_5, %c0_6], %6 {strides = array<i32>} : memref<16x32xbf16, #tpu.memory_space<vmem>>, vector<16x32xbf16>,
    return
  }
  func.func @transform_0(%arg0: i32) -> (i32, i32) {
    %c0_i32 = arith.constant 0 : i32
    %c0_i32_0 = arith.constant 0 : i32
    return %arg0, %c0_i32 : i32, i32
  }
  func.func @transform_1(%arg0: i32) -> (i32, i32) {
    %c0_i32 = arith.constant 0 : i32
    %c0_i32_0 = arith.constant 0 : i32
    %c0_i32_1 = arith.constant 0 : i32
    return %c0_i32, %c0_i32_0 : i32, i32
  }
  func.func @transform_2(%arg0: i32) -> (i32, i32) {
    %c0_i32 = arith.constant 0 : i32
    %c0_i32_0 = arith.constant 0 : i32
    %c0_i32_1 = arith.constant 0 : i32
    return %c0_i32, %c0_i32_0 : i32, i32
  }
  func.func @transform_3(%arg0: i32) -> (i32, i32) {
    %c0_i32 = arith.constant 0 : i32
    %c0_i32_0 = arith.constant 0 : i32
    return %arg0, %c0_i32 : i32, i32
  }
}

module attributes {stable_mosaic.version = 11 : i64} {
  func.func @_mm_bias_kernel(%arg0: i32, %arg1: memref<16x288xbf16, #tpu.memory_space<vmem>>, %arg2: memref<288x8xbf16, #tpu.memory_space<vmem>>, %arg3: memref<1x8xf32, #tpu.memory_space<vmem>>, %arg4: memref<16x8xbf16, #tpu.memory_space<vmem>>) attributes {dimension_semantics = [#tpu.dimension_semantics<parallel>], iteration_bounds = array<i64: 2>, scalar_prefetch = 0 : i64, scratch_operands = 0 : i64, tpu.core_type = #tpu.core_type<tc>, window_params = [{transform_indices = @transform_0, window_bounds = array<i64: 16, 288>}, {pipeline_mode = #tpu.pipeline_mode<synchronous>, transform_indices = @transform_1, window_bounds = array<i64: 288, 8>}, {pipeline_mode = #tpu.pipeline_mode<synchronous>, transform_indices = @transform_2, window_bounds = array<i64: 1, 8>}, {transform_indices = @transform_3, window_bounds = array<i64: 16, 8>}]} {
    %c0 = arith.constant 0 : index
    %c0_0 = arith.constant 0 : index
    %0 = vector.load %arg1[%c0, %c0_0] : memref<16x288xbf16, #tpu.memory_space<vmem>>, vector<16x288xbf16>
    %c0_1 = arith.constant 0 : index
    %c0_2 = arith.constant 0 : index
    %1 = vector.load %arg2[%c0_1, %c0_2] : memref<288x8xbf16, #tpu.memory_space<vmem>>, vector<288x8xbf16>
    %cst = arith.constant dense<0.000000e+00> : vector<16x8xf32>
    %2 = tpu.matmul %0, %1, %cst {dimension_numbers = #tpu.dot_dimension_numbers<[1], [0], [0], [1], [0, 0, 1, 1], [], []>} : vector<16x288xbf16>, vector<288x8xbf16>, vector<16x8xf32> -> vector<16x8xf32>
    %c0_3 = arith.constant 0 : index
    %c0_4 = arith.constant 0 : index
    %3 = vector.load %arg3[%c0_3, %c0_4] : memref<1x8xf32, #tpu.memory_space<vmem>>, vector<1x8xf32>
    %4 = vector.broadcast %3 : vector<1x8xf32> to vector<16x8xf32>
    %5 = arith.addf %2, %4 : vector<16x8xf32>
    %cst_5 = arith.constant 0.000000e+00 : f32
    %6 = vector.broadcast %cst_5 : f32 to vector<16x8xf32>
    %7 = arith.maximumf %5, %6 : vector<16x8xf32>
    %8 = arith.truncf %7 : vector<16x8xf32> to vector<16x8xbf16>
    %c0_6 = arith.constant 0 : index
    %c0_7 = arith.constant 0 : index
    %9 = vector.load %arg4[%c0_6, %c0_7] : memref<16x8xbf16, #tpu.memory_space<vmem>>, vector<16x8xbf16>
    tpu.vector_store %arg4[%c0_6, %c0_7], %8 {strides = array<i32>} : memref<16x8xbf16, #tpu.memory_space<vmem>>, vector<16x8xbf16>,
    return
  }
  func.func @transform_0(%arg0: i32) -> (i32, i32) {
    %c0_i32 = arith.constant 0 : i32
    %c0_i32_0 = arith.constant 0 : i32
    return %arg0, %c0_i32 : i32, i32
  }
  func.func @transform_1(%arg0: i32) -> (i32, i32) {
    %c0_i32 = arith.constant 0 : i32
    %c0_i32_0 = arith.constant 0 : i32
    %c0_i32_1 = arith.constant 0 : i32
    return %c0_i32, %c0_i32_0 : i32, i32
  }
  func.func @transform_2(%arg0: i32) -> (i32, i32) {
    %c0_i32 = arith.constant 0 : i32
    %c0_i32_0 = arith.constant 0 : i32
    %c0_i32_1 = arith.constant 0 : i32
    return %c0_i32, %c0_i32_0 : i32, i32
  }
  func.func @transform_3(%arg0: i32) -> (i32, i32) {
    %c0_i32 = arith.constant 0 : i32
    %c0_i32_0 = arith.constant 0 : i32
    return %arg0, %c0_i32 : i32, i32
  }
}

module attributes {stable_mosaic.version = 11 : i64} {
  func.func @_mm_bias_kernel(%arg0: i32, %arg1: memref<16x8xbf16, #tpu.memory_space<vmem>>, %arg2: memref<8x32xbf16, #tpu.memory_space<vmem>>, %arg3: memref<1x32xf32, #tpu.memory_space<vmem>>, %arg4: memref<16x32xbf16, #tpu.memory_space<vmem>>) attributes {dimension_semantics = [#tpu.dimension_semantics<parallel>], iteration_bounds = array<i64: 2>, scalar_prefetch = 0 : i64, scratch_operands = 0 : i64, tpu.core_type = #tpu.core_type<tc>, window_params = [{transform_indices = @transform_0, window_bounds = array<i64: 16, 8>}, {pipeline_mode = #tpu.pipeline_mode<synchronous>, transform_indices = @transform_1, window_bounds = array<i64: 8, 32>}, {pipeline_mode = #tpu.pipeline_mode<synchronous>, transform_indices = @transform_2, window_bounds = array<i64: 1, 32>}, {transform_indices = @transform_3, window_bounds = array<i64: 16, 32>}]} {
    %c0 = arith.constant 0 : index
    %c0_0 = arith.constant 0 : index
    %0 = vector.load %arg1[%c0, %c0_0] : memref<16x8xbf16, #tpu.memory_space<vmem>>, vector<16x8xbf16>
    %c0_1 = arith.constant 0 : index
    %c0_2 = arith.constant 0 : index
    %1 = vector.load %arg2[%c0_1, %c0_2] : memref<8x32xbf16, #tpu.memory_space<vmem>>, vector<8x32xbf16>
    %cst = arith.constant dense<0.000000e+00> : vector<16x32xf32>
    %2 = tpu.matmul %0, %1, %cst {dimension_numbers = #tpu.dot_dimension_numbers<[1], [0], [0], [1], [0, 0, 1, 1], [], []>} : vector<16x8xbf16>, vector<8x32xbf16>, vector<16x32xf32> -> vector<16x32xf32>
    %c0_3 = arith.constant 0 : index
    %c0_4 = arith.constant 0 : index
    %3 = vector.load %arg3[%c0_3, %c0_4] : memref<1x32xf32, #tpu.memory_space<vmem>>, vector<1x32xf32>
    %4 = vector.broadcast %3 : vector<1x32xf32> to vector<16x32xf32>
    %5 = arith.addf %2, %4 : vector<16x32xf32>
    %6 = arith.truncf %5 : vector<16x32xf32> to vector<16x32xbf16>
    %c0_5 = arith.constant 0 : index
    %c0_6 = arith.constant 0 : index
    %7 = vector.load %arg4[%c0_5, %c0_6] : memref<16x32xbf16, #tpu.memory_space<vmem>>, vector<16x32xbf16>
    tpu.vector_store %arg4[%c0_5, %c0_6], %6 {strides = array<i32>} : memref<16x32xbf16, #tpu.memory_space<vmem>>, vector<16x32xbf16>,
    return
  }
  func.func @transform_0(%arg0: i32) -> (i32, i32) {
    %c0_i32 = arith.constant 0 : i32
    %c0_i32_0 = arith.constant 0 : i32
    return %arg0, %c0_i32 : i32, i32
  }
  func.func @transform_1(%arg0: i32) -> (i32, i32) {
    %c0_i32 = arith.constant 0 : i32
    %c0_i32_0 = arith.constant 0 : i32
    %c0_i32_1 = arith.constant 0 : i32
    return %c0_i32, %c0_i32_0 : i32, i32
  }
  func.func @transform_2(%arg0: i32) -> (i32, i32) {
    %c0_i32 = arith.constant 0 : i32
    %c0_i32_0 = arith.constant 0 : i32
    %c0_i32_1 = arith.constant 0 : i32
    return %c0_i32, %c0_i32_0 : i32, i32
  }
  func.func @transform_3(%arg0: i32) -> (i32, i32) {
    %c0_i32 = arith.constant 0 : i32
    %c0_i32_0 = arith.constant 0 : i32
    return %arg0, %c0_i32 : i32, i32
  }
}

module attributes {stable_mosaic.version = 11 : i64} {
  func.func @_mm_bias_kernel(%arg0: i32, %arg1: memref<16x32xbf16, #tpu.memory_space<vmem>>, %arg2: memref<32x8xbf16, #tpu.memory_space<vmem>>, %arg3: memref<1x8xf32, #tpu.memory_space<vmem>>, %arg4: memref<16x8xf32, #tpu.memory_space<vmem>>) attributes {dimension_semantics = [#tpu.dimension_semantics<parallel>], iteration_bounds = array<i64: 2>, scalar_prefetch = 0 : i64, scratch_operands = 0 : i64, tpu.core_type = #tpu.core_type<tc>, window_params = [{transform_indices = @transform_0, window_bounds = array<i64: 16, 32>}, {pipeline_mode = #tpu.pipeline_mode<synchronous>, transform_indices = @transform_1, window_bounds = array<i64: 32, 8>}, {pipeline_mode = #tpu.pipeline_mode<synchronous>, transform_indices = @transform_2, window_bounds = array<i64: 1, 8>}, {transform_indices = @transform_3, window_bounds = array<i64: 16, 8>}]} {
    %c0 = arith.constant 0 : index
    %c0_0 = arith.constant 0 : index
    %0 = vector.load %arg1[%c0, %c0_0] : memref<16x32xbf16, #tpu.memory_space<vmem>>, vector<16x32xbf16>
    %c0_1 = arith.constant 0 : index
    %c0_2 = arith.constant 0 : index
    %1 = vector.load %arg2[%c0_1, %c0_2] : memref<32x8xbf16, #tpu.memory_space<vmem>>, vector<32x8xbf16>
    %cst = arith.constant dense<0.000000e+00> : vector<16x8xf32>
    %2 = tpu.matmul %0, %1, %cst {dimension_numbers = #tpu.dot_dimension_numbers<[1], [0], [0], [1], [0, 0, 1, 1], [], []>} : vector<16x32xbf16>, vector<32x8xbf16>, vector<16x8xf32> -> vector<16x8xf32>
    %c0_3 = arith.constant 0 : index
    %c0_4 = arith.constant 0 : index
    %3 = vector.load %arg3[%c0_3, %c0_4] : memref<1x8xf32, #tpu.memory_space<vmem>>, vector<1x8xf32>
    %4 = vector.broadcast %3 : vector<1x8xf32> to vector<16x8xf32>
    %5 = arith.addf %2, %4 : vector<16x8xf32>
    %c0_5 = arith.constant 0 : index
    %c0_6 = arith.constant 0 : index
    %6 = vector.load %arg4[%c0_5, %c0_6] : memref<16x8xf32, #tpu.memory_space<vmem>>, vector<16x8xf32>
    tpu.vector_store %arg4[%c0_5, %c0_6], %5 {strides = array<i32>} : memref<16x8xf32, #tpu.memory_space<vmem>>, vector<16x8xf32>,
    return
  }
  func.func @transform_0(%arg0: i32) -> (i32, i32) {
    %c0_i32 = arith.constant 0 : i32
    %c0_i32_0 = arith.constant 0 : i32
    return %arg0, %c0_i32 : i32, i32
  }
  func.func @transform_1(%arg0: i32) -> (i32, i32) {
    %c0_i32 = arith.constant 0 : i32
    %c0_i32_0 = arith.constant 0 : i32
    %c0_i32_1 = arith.constant 0 : i32
    return %c0_i32, %c0_i32_0 : i32, i32
  }
  func.func @transform_2(%arg0: i32) -> (i32, i32) {
    %c0_i32 = arith.constant 0 : i32
    %c0_i32_0 = arith.constant 0 : i32
    %c0_i32_1 = arith.constant 0 : i32
    return %c0_i32, %c0_i32_0 : i32, i32
  }
  func.func @transform_3(%arg0: i32) -> (i32, i32) {
    %c0_i32 = arith.constant 0 : i32
    %c0_i32_0 = arith.constant 0 : i32
    return %arg0, %c0_i32 : i32, i32
  }
}

module attributes {stable_mosaic.version = 11 : i64} {
  func.func @_vq_kernel(%arg0: i32, %arg1: memref<16x8xf32, #tpu.memory_space<vmem>>, %arg2: memref<16x8xf32, #tpu.memory_space<vmem>>, %arg3: memref<1x16xf32, #tpu.memory_space<vmem>>, %arg4: memref<16x8xf32, #tpu.memory_space<vmem>>, %arg5: memref<1x1x8xf32, #tpu.memory_space<vmem>>, %arg6: memref<1x1x16xf32, #tpu.memory_space<vmem>>) attributes {dimension_semantics = [#tpu.dimension_semantics<parallel>], iteration_bounds = array<i64: 2>, scalar_prefetch = 0 : i64, scratch_operands = 0 : i64, tpu.core_type = #tpu.core_type<tc>, window_params = [{transform_indices = @transform_0, window_bounds = array<i64: 16, 8>}, {pipeline_mode = #tpu.pipeline_mode<synchronous>, transform_indices = @transform_1, window_bounds = array<i64: 16, 8>}, {pipeline_mode = #tpu.pipeline_mode<synchronous>, transform_indices = @transform_2, window_bounds = array<i64: 1, 16>}, {transform_indices = @transform_3, window_bounds = array<i64: 16, 8>}, {transform_indices = @transform_4, window_bounds = array<i64: 1, 1, 8>}, {transform_indices = @transform_5, window_bounds = array<i64: 1, 1, 16>}]} {
    %c0 = arith.constant 0 : index
    %c0_0 = arith.constant 0 : index
    %0 = vector.load %arg1[%c0, %c0_0] : memref<16x8xf32, #tpu.memory_space<vmem>>, vector<16x8xf32>
    %c0_1 = arith.constant 0 : index
    %c0_2 = arith.constant 0 : index
    %1 = vector.load %arg2[%c0_1, %c0_2] : memref<16x8xf32, #tpu.memory_space<vmem>>, vector<16x8xf32>
    %2 = arith.mulf %0, %0 : vector<16x8xf32>
    %cst = arith.constant dense<0.000000e+00> : vector<16xf32>
    %3 = vector.multi_reduction <add>, %2, %cst [1] : vector<16x8xf32> to vector<16xf32>
    %4 = vector.shape_cast %3 : vector<16xf32> to vector<16x1xf32>
    %cst_3 = arith.constant dense<0.000000e+00> : vector<16x16xf32>
    %5 = tpu.matmul %0, %1, %cst_3 {dimension_numbers = #tpu.dot_dimension_numbers<[1], [1], [0], [0], [0, 0, 1, 0], [], []>} : vector<16x8xf32>, vector<16x8xf32>, vector<16x16xf32> -> vector<16x16xf32>
    %cst_4 = arith.constant 2.000000e+00 : f32
    %6 = vector.broadcast %cst_4 : f32 to vector<16x16xf32>
    %7 = arith.mulf %6, %5 : vector<16x16xf32>
    %8 = vector.broadcast %4 : vector<16x1xf32> to vector<16x16xf32>
    %9 = arith.subf %8, %7 : vector<16x16xf32>
    %c0_5 = arith.constant 0 : index
    %c0_6 = arith.constant 0 : index
    %10 = vector.load %arg3[%c0_5, %c0_6] : memref<1x16xf32, #tpu.memory_space<vmem>>, vector<1x16xf32>
    %11 = vector.broadcast %10 : vector<1x16xf32> to vector<16x16xf32>
    %12 = arith.addf %9, %11 : vector<16x16xf32>
    %13 = tpu.iota {dimensions = array<i32: 1>} : vector<16x16xi32>
    %cst_7 = arith.constant dense<0x7F800000> : vector<16xf32>
    %14 = vector.multi_reduction <minimumf>, %12, %cst_7 [1] : vector<16x16xf32> to vector<16xf32>
    %15 = vector.shape_cast %14 : vector<16xf32> to vector<16x1xf32>
    %16 = vector.broadcast %15 : vector<16x1xf32> to vector<16x16xf32>
    %17 = arith.cmpf ole, %12, %16 : vector<16x16xf32>
    %c16_i32 = arith.constant 16 : i32
    %18 = vector.broadcast %c16_i32 : i32 to vector<16x16xi32>
    %19 = arith.select %17, %13, %18 : vector<16x16xi1>, vector<16x16xi32>
    %cst_8 = arith.constant dense<2147483647> : vector<16xi32>
    %20 = vector.multi_reduction <minsi>, %19, %cst_8 [1] : vector<16x16xi32> to vector<16xi32>
    %21 = vector.shape_cast %20 : vector<16xi32> to vector<16x1xi32>
    %22 = vector.broadcast %21 : vector<16x1xi32> to vector<16x16xi32>
    %23 = arith.cmpi eq, %13, %22 : vector<16x16xi32>
    %24 = arith.extui %23 : vector<16x16xi1> to vector<16x16xi32>
    %25 = arith.sitofp %24 : vector<16x16xi32> to vector<16x16xf32>
    %cst_9 = arith.constant dense<0.000000e+00> : vector<16x8xf32>
    %26 = tpu.matmul %25, %1, %cst_9 {dimension_numbers = #tpu.dot_dimension_numbers<[1], [0], [0], [1], [0, 0, 1, 1], [], []>} : vector<16x16xf32>, vector<16x8xf32>, vector<16x8xf32> -> vector<16x8xf32>
    %c0_10 = arith.constant 0 : index
    %c0_11 = arith.constant 0 : index
    %27 = vector.load %arg4[%c0_10, %c0_11] : memref<16x8xf32, #tpu.memory_space<vmem>>, vector<16x8xf32>
    tpu.vector_store %arg4[%c0_10, %c0_11], %26 {strides = array<i32>} : memref<16x8xf32, #tpu.memory_space<vmem>>, vector<16x8xf32>,
    %28 = tpu.iota {dimensions = array<i32: 0>} : vector<16x1xi32>
    %c16_i32_12 = arith.constant 16 : i32
    %29 = arith.muli %arg0, %c16_i32_12 : i32
    %30 = vector.broadcast %29 : i32 to vector<16x1xi32>
    %31 = arith.addi %28, %30 : vector<16x1xi32>
    %c32_i32 = arith.constant 32 : i32
    %32 = vector.broadcast %c32_i32 : i32 to vector<16x1xi32>
    %33 = arith.cmpi slt, %31, %32 : vector<16x1xi32>
    %34 = arith.subf %26, %0 : vector<16x8xf32>
    %cst_13 = arith.constant 0.000000e+00 : f32
    %35 = vector.shape_cast %33 : vector<16x1xi1> to vector<16x1xi1>
    %36 = vector.broadcast %35 : vector<16x1xi1> to vector<16x8xi1>
    %37 = vector.broadcast %cst_13 : f32 to vector<16x8xf32>
    %38 = arith.select %36, %34, %37 : vector<16x8xi1>, vector<16x8xf32>
    %39 = arith.mulf %38, %38 : vector<16x8xf32>
    %cst_14 = arith.constant dense<0.000000e+00> : vector<8xf32>
    %40 = vector.multi_reduction <add>, %39, %cst_14 [0] : vector<16x8xf32> to vector<8xf32>
    %41 = vector.shape_cast %40 : vector<8xf32> to vector<1x1x8xf32>
    %c0_15 = arith.constant 0 : index
    %c0_16 = arith.constant 0 : index
    %c0_17 = arith.constant 0 : index
    %42 = vector.load %arg5[%c0_15, %c0_16, %c0_17] : memref<1x1x8xf32, #tpu.memory_space<vmem>>, vector<1x1x8xf32>
    tpu.vector_store %arg5[%c0_15, %c0_16, %c0_17], %41 {strides = array<i32>} : memref<1x1x8xf32, #tpu.memory_space<vmem>>, vector<1x1x8xf32>,
    %cst_18 = arith.constant 0.000000e+00 : f32
    %43 = vector.shape_cast %33 : vector<16x1xi1> to vector<16x1xi1>
    %44 = vector.broadcast %43 : vector<16x1xi1> to vector<16x16xi1>
    %45 = vector.broadcast %cst_18 : f32 to vector<16x16xf32>
    %46 = arith.select %44, %25, %45 : vector<16x16xi1>, vector<16x16xf32>
    %cst_19 = arith.constant dense<0.000000e+00> : vector<16xf32>
    %47 = vector.multi_reduction <add>, %46, %cst_19 [0] : vector<16x16xf32> to vector<16xf32>
    %48 = vector.shape_cast %47 : vector<16xf32> to vector<1x1x16xf32>
    %c0_20 = arith.constant 0 : index
    %c0_21 = arith.constant 0 : index
    %c0_22 = arith.constant 0 : index
    %49 = vector.load %arg6[%c0_20, %c0_21, %c0_22] : memref<1x1x16xf32, #tpu.memory_space<vmem>>, vector<1x1x16xf32>
    tpu.vector_store %arg6[%c0_20, %c0_21, %c0_22], %48 {strides = array<i32>} : memref<1x1x16xf32, #tpu.memory_space<vmem>>, vector<1x1x16xf32>,
    return
  }
  func.func @transform_0(%arg0: i32) -> (i32, i32) {
    %c0_i32 = arith.constant 0 : i32
    %c0_i32_0 = arith.constant 0 : i32
    return %arg0, %c0_i32 : i32, i32
  }
  func.func @transform_1(%arg0: i32) -> (i32, i32) {
    %c0_i32 = arith.constant 0 : i32
    %c0_i32_0 = arith.constant 0 : i32
    %c0_i32_1 = arith.constant 0 : i32
    return %c0_i32, %c0_i32_0 : i32, i32
  }
  func.func @transform_2(%arg0: i32) -> (i32, i32) {
    %c0_i32 = arith.constant 0 : i32
    %c0_i32_0 = arith.constant 0 : i32
    %c0_i32_1 = arith.constant 0 : i32
    return %c0_i32, %c0_i32_0 : i32, i32
  }
  func.func @transform_3(%arg0: i32) -> (i32, i32) {
    %c0_i32 = arith.constant 0 : i32
    %c0_i32_0 = arith.constant 0 : i32
    return %arg0, %c0_i32 : i32, i32
  }
  func.func @transform_4(%arg0: i32) -> (i32, i32, i32) {
    %c0_i32 = arith.constant 0 : i32
    %c0_i32_0 = arith.constant 0 : i32
    %c0_i32_1 = arith.constant 0 : i32
    return %arg0, %c0_i32, %c0_i32_0 : i32, i32, i32
  }
  func.func @transform_5(%arg0: i32) -> (i32, i32, i32) {
    %c0_i32 = arith.constant 0 : i32
    %c0_i32_0 = arith.constant 0 : i32
    %c0_i32_1 = arith.constant 0 : i32
    return %arg0, %c0_i32, %c0_i32_0 : i32, i32, i32
  }
}

module attributes {stable_mosaic.version = 11 : i64} {
  func.func @_mm_bias_kernel(%arg0: i32, %arg1: memref<16x72xbf16, #tpu.memory_space<vmem>>, %arg2: memref<72x32xbf16, #tpu.memory_space<vmem>>, %arg3: memref<1x32xf32, #tpu.memory_space<vmem>>, %arg4: memref<16x32xbf16, #tpu.memory_space<vmem>>) attributes {dimension_semantics = [#tpu.dimension_semantics<parallel>], iteration_bounds = array<i64: 2>, scalar_prefetch = 0 : i64, scratch_operands = 0 : i64, tpu.core_type = #tpu.core_type<tc>, window_params = [{transform_indices = @transform_0, window_bounds = array<i64: 16, 72>}, {pipeline_mode = #tpu.pipeline_mode<synchronous>, transform_indices = @transform_1, window_bounds = array<i64: 72, 32>}, {pipeline_mode = #tpu.pipeline_mode<synchronous>, transform_indices = @transform_2, window_bounds = array<i64: 1, 32>}, {transform_indices = @transform_3, window_bounds = array<i64: 16, 32>}]} {
    %c0 = arith.constant 0 : index
    %c0_0 = arith.constant 0 : index
    %0 = vector.load %arg1[%c0, %c0_0] : memref<16x72xbf16, #tpu.memory_space<vmem>>, vector<16x72xbf16>
    %c0_1 = arith.constant 0 : index
    %c0_2 = arith.constant 0 : index
    %1 = vector.load %arg2[%c0_1, %c0_2] : memref<72x32xbf16, #tpu.memory_space<vmem>>, vector<72x32xbf16>
    %cst = arith.constant dense<0.000000e+00> : vector<16x32xf32>
    %2 = tpu.matmul %0, %1, %cst {dimension_numbers = #tpu.dot_dimension_numbers<[1], [0], [0], [1], [0, 0, 1, 1], [], []>} : vector<16x72xbf16>, vector<72x32xbf16>, vector<16x32xf32> -> vector<16x32xf32>
    %c0_3 = arith.constant 0 : index
    %c0_4 = arith.constant 0 : index
    %3 = vector.load %arg3[%c0_3, %c0_4] : memref<1x32xf32, #tpu.memory_space<vmem>>, vector<1x32xf32>
    %4 = vector.broadcast %3 : vector<1x32xf32> to vector<16x32xf32>
    %5 = arith.addf %2, %4 : vector<16x32xf32>
    %6 = arith.truncf %5 : vector<16x32xf32> to vector<16x32xbf16>
    %c0_5 = arith.constant 0 : index
    %c0_6 = arith.constant 0 : index
    %7 = vector.load %arg4[%c0_5, %c0_6] : memref<16x32xbf16, #tpu.memory_space<vmem>>, vector<16x32xbf16>
    tpu.vector_store %arg4[%c0_5, %c0_6], %6 {strides = array<i32>} : memref<16x32xbf16, #tpu.memory_space<vmem>>, vector<16x32xbf16>,
    return
  }
  func.func @transform_0(%arg0: i32) -> (i32, i32) {
    %c0_i32 = arith.constant 0 : i32
    %c0_i32_0 = arith.constant 0 : i32
    return %arg0, %c0_i32 : i32, i32
  }
  func.func @transform_1(%arg0: i32) -> (i32, i32) {
    %c0_i32 = arith.constant 0 : i32
    %c0_i32_0 = arith.constant 0 : i32
    %c0_i32_1 = arith.constant 0 : i32
    return %c0_i32, %c0_i32_0 : i32, i32
  }
  func.func @transform_2(%arg0: i32) -> (i32, i32) {
    %c0_i32 = arith.constant 0 : i32
    %c0_i32_0 = arith.constant 0 : i32
    %c0_i32_1 = arith.constant 0 : i32
    return %c0_i32, %c0_i32_0 : i32, i32
  }
  func.func @transform_3(%arg0: i32) -> (i32, i32) {
    %c0_i32 = arith.constant 0 : i32
    %c0_i32_0 = arith.constant 0 : i32
    return %arg0, %c0_i32 : i32, i32
  }
}

module attributes {stable_mosaic.version = 11 : i64} {
  func.func @_mm_bias_kernel(%arg0: i32, %arg1: memref<32x128xbf16, #tpu.memory_space<vmem>>, %arg2: memref<128x64xbf16, #tpu.memory_space<vmem>>, %arg3: memref<1x64xf32, #tpu.memory_space<vmem>>, %arg4: memref<32x64xbf16, #tpu.memory_space<vmem>>) attributes {dimension_semantics = [#tpu.dimension_semantics<parallel>], iteration_bounds = array<i64: 2>, scalar_prefetch = 0 : i64, scratch_operands = 0 : i64, tpu.core_type = #tpu.core_type<tc>, window_params = [{transform_indices = @transform_0, window_bounds = array<i64: 32, 128>}, {pipeline_mode = #tpu.pipeline_mode<synchronous>, transform_indices = @transform_1, window_bounds = array<i64: 128, 64>}, {pipeline_mode = #tpu.pipeline_mode<synchronous>, transform_indices = @transform_2, window_bounds = array<i64: 1, 64>}, {transform_indices = @transform_3, window_bounds = array<i64: 32, 64>}]} {
    %c0 = arith.constant 0 : index
    %c0_0 = arith.constant 0 : index
    %0 = vector.load %arg1[%c0, %c0_0] : memref<32x128xbf16, #tpu.memory_space<vmem>>, vector<32x128xbf16>
    %c0_1 = arith.constant 0 : index
    %c0_2 = arith.constant 0 : index
    %1 = vector.load %arg2[%c0_1, %c0_2] : memref<128x64xbf16, #tpu.memory_space<vmem>>, vector<128x64xbf16>
    %cst = arith.constant dense<0.000000e+00> : vector<32x64xf32>
    %2 = tpu.matmul %0, %1, %cst {dimension_numbers = #tpu.dot_dimension_numbers<[1], [0], [0], [1], [0, 0, 1, 1], [], []>} : vector<32x128xbf16>, vector<128x64xbf16>, vector<32x64xf32> -> vector<32x64xf32>
    %c0_3 = arith.constant 0 : index
    %c0_4 = arith.constant 0 : index
    %3 = vector.load %arg3[%c0_3, %c0_4] : memref<1x64xf32, #tpu.memory_space<vmem>>, vector<1x64xf32>
    %4 = vector.broadcast %3 : vector<1x64xf32> to vector<32x64xf32>
    %5 = arith.addf %2, %4 : vector<32x64xf32>
    %cst_5 = arith.constant 0.000000e+00 : f32
    %6 = vector.broadcast %cst_5 : f32 to vector<32x64xf32>
    %7 = arith.maximumf %5, %6 : vector<32x64xf32>
    %8 = arith.truncf %7 : vector<32x64xf32> to vector<32x64xbf16>
    %c0_6 = arith.constant 0 : index
    %c0_7 = arith.constant 0 : index
    %9 = vector.load %arg4[%c0_6, %c0_7] : memref<32x64xbf16, #tpu.memory_space<vmem>>, vector<32x64xbf16>
    tpu.vector_store %arg4[%c0_6, %c0_7], %8 {strides = array<i32>} : memref<32x64xbf16, #tpu.memory_space<vmem>>, vector<32x64xbf16>,
    return
  }
  func.func @transform_0(%arg0: i32) -> (i32, i32) {
    %c0_i32 = arith.constant 0 : i32
    %c0_i32_0 = arith.constant 0 : i32
    return %arg0, %c0_i32 : i32, i32
  }
  func.func @transform_1(%arg0: i32) -> (i32, i32) {
    %c0_i32 = arith.constant 0 : i32
    %c0_i32_0 = arith.constant 0 : i32
    %c0_i32_1 = arith.constant 0 : i32
    return %c0_i32, %c0_i32_0 : i32, i32
  }
  func.func @transform_2(%arg0: i32) -> (i32, i32) {
    %c0_i32 = arith.constant 0 : i32
    %c0_i32_0 = arith.constant 0 : i32
    %c0_i32_1 = arith.constant 0 : i32
    return %c0_i32, %c0_i32_0 : i32, i32
  }
  func.func @transform_3(%arg0: i32) -> (i32, i32) {
    %c0_i32 = arith.constant 0 : i32
    %c0_i32_0 = arith.constant 0 : i32
    return %arg0, %c0_i32 : i32, i32
  }
}

module attributes {stable_mosaic.version = 11 : i64} {
  func.func @_mm_bias_kernel(%arg0: i32, %arg1: memref<88x64xbf16, #tpu.memory_space<vmem>>, %arg2: memref<64x12xbf16, #tpu.memory_space<vmem>>, %arg3: memref<1x12xf32, #tpu.memory_space<vmem>>, %arg4: memref<88x12xf32, #tpu.memory_space<vmem>>) attributes {dimension_semantics = [#tpu.dimension_semantics<parallel>], iteration_bounds = array<i64: 2>, scalar_prefetch = 0 : i64, scratch_operands = 0 : i64, tpu.core_type = #tpu.core_type<tc>, window_params = [{transform_indices = @transform_0, window_bounds = array<i64: 88, 64>}, {pipeline_mode = #tpu.pipeline_mode<synchronous>, transform_indices = @transform_1, window_bounds = array<i64: 64, 12>}, {pipeline_mode = #tpu.pipeline_mode<synchronous>, transform_indices = @transform_2, window_bounds = array<i64: 1, 12>}, {transform_indices = @transform_3, window_bounds = array<i64: 88, 12>}]} {
    %c0 = arith.constant 0 : index
    %c0_0 = arith.constant 0 : index
    %0 = vector.load %arg1[%c0, %c0_0] : memref<88x64xbf16, #tpu.memory_space<vmem>>, vector<88x64xbf16>
    %c0_1 = arith.constant 0 : index
    %c0_2 = arith.constant 0 : index
    %1 = vector.load %arg2[%c0_1, %c0_2] : memref<64x12xbf16, #tpu.memory_space<vmem>>, vector<64x12xbf16>
    %cst = arith.constant dense<0.000000e+00> : vector<88x12xf32>
    %2 = tpu.matmul %0, %1, %cst {dimension_numbers = #tpu.dot_dimension_numbers<[1], [0], [0], [1], [0, 0, 1, 1], [], []>} : vector<88x64xbf16>, vector<64x12xbf16>, vector<88x12xf32> -> vector<88x12xf32>
    %c0_3 = arith.constant 0 : index
    %c0_4 = arith.constant 0 : index
    %3 = vector.load %arg3[%c0_3, %c0_4] : memref<1x12xf32, #tpu.memory_space<vmem>>, vector<1x12xf32>
    %4 = vector.broadcast %3 : vector<1x12xf32> to vector<88x12xf32>
    %5 = arith.addf %2, %4 : vector<88x12xf32>
    %c0_5 = arith.constant 0 : index
    %c0_6 = arith.constant 0 : index
    %6 = vector.load %arg4[%c0_5, %c0_6] : memref<88x12xf32, #tpu.memory_space<vmem>>, vector<88x12xf32>
    tpu.vector_store %arg4[%c0_5, %c0_6], %5 {strides = array<i32>} : memref<88x12xf32, #tpu.memory_space<vmem>>, vector<88x12xf32>,
    return
  }
  func.func @transform_0(%arg0: i32) -> (i32, i32) {
    %c0_i32 = arith.constant 0 : i32
    %c0_i32_0 = arith.constant 0 : i32
    return %arg0, %c0_i32 : i32, i32
  }
  func.func @transform_1(%arg0: i32) -> (i32, i32) {
    %c0_i32 = arith.constant 0 : i32
    %c0_i32_0 = arith.constant 0 : i32
    %c0_i32_1 = arith.constant 0 : i32
    return %c0_i32, %c0_i32_0 : i32, i32
  }
  func.func @transform_2(%arg0: i32) -> (i32, i32) {
    %c0_i32 = arith.constant 0 : i32
    %c0_i32_0 = arith.constant 0 : i32
    %c0_i32_1 = arith.constant 0 : i32
    return %c0_i32, %c0_i32_0 : i32, i32
  }
  func.func @transform_3(%arg0: i32) -> (i32, i32) {
    %c0_i32 = arith.constant 0 : i32
    %c0_i32_0 = arith.constant 0 : i32
    return %arg0, %c0_i32 : i32, i32
  }
}

</mosaic_0001>

<bundles_post_ra>
// kernel: vqvae_forward.16
= control target key start
LH: loop header
LB: loop body
LE: loop exit
PB: predicated region body
PF: predicated region fallthrough
CT: control target
= control target key end

     0   :  { %s526_s12 = smov 0   ;;  %s570_s0 = inlined_call_operand.vmem [shape: bf16[128,48], index: 0, kind: input, shape index: {}]   ;;  %s571_s1 = inlined_call_operand.vmem [shape: bf16[48,16], index: 1, kind: input, shape index: {}]   ;;  %s572_s2 = inlined_call_operand.vmem [shape: f32[1,16], index: 2, kind: input, shape index: {}]   ;;  %s573_s3 = inlined_call_operand.vmem [shape: bf16[128,16], index: 3, kind: output, shape index: {}]  }
   0x1 LB: > { %s417_s13 = sadd.s32 4294967295, %s504_s12   ;;  %p421_p0 = scmp.ge.s32.totalorder %s504_s12, 1  ;;  %s504_s12 = sphi %s526_s12, %s13_s12  }
   0x2   : > { %p138_p1 = scmp.lt.s32.totalorder %s504_s12, 3 }
   0x4   : > { %p139_p2 = pnand %p421_p0, %p138_p1 }
   0x5   : > { %v491_v0 = vld [vmem:[%s571_s1] sm:$0xff] (!%p139_p2)   ;;  %s422_s16 = sshll.u32 (!%p139_p2), %s417_s13, 3  ;;  %v492_v1 = vld [vmem:[%s571_s1 + $0x8] sm:$0xff] (!%p139_p2)   ;;  %v493_v2 = vld [vmem:[%s571_s1 + $0x10] sm:$0xff] (!%p139_p2)   ;;  %vm234_vm0 = vcmask (!%p139_p2), 392192   ;;  %vm352_vm1 = vcmask (!%p139_p2), 125952  }
   0x6   : > { %142 = sbr.rel (%p139_p2) target bundleno = 240 (0xf0), region = 32  ;;  %p163_p3 = scmp.lt.s32.totalorder (!%p139_p2), %s422_s16, 15  ;;  %463 = vmatprep.subr.bf16.mxu0 (!%p139_p2), %v491_v0  ;;  %477 = vmatprep.subr.bf16.mxu1 (!%p139_p2), %v491_v0  ;;  %v426_v7 = vld [vmem:[%s572_s2] ss:$0 sm:$0xff] (!%p139_p2) }
   0x7   : > { %464 = vmatpush3.bf16.msra.mxu0 (!%p139_p2), %v491_v0  ;;  %480 = vmatpush3.bf16.msra.mxu1 (!%p139_p2), %v491_v0 }
   0x8   : > { %465 = vmatprep.subr.bf16.mxu0 (!%p139_p2), %v492_v1  ;;  %478 = vmatprep.subr.bf16.mxu1 (!%p139_p2), %v492_v1 }
   0xb   : > { %466 = vmatpush3.bf16.msra.mxu0 (!%p139_p2), %v492_v1  ;;  %481 = vmatpush3.bf16.msra.mxu1 (!%p139_p2), %v492_v1 }
   0xc   : > { %467 = vmatprep.subr.bf16.mxu0 (!%p139_p2), %v493_v2  ;;  %479 = vmatprep.subr.bf16.mxu1 (!%p139_p2), %v493_v2 }
   0xd   : > { %s575_s16 = smov (!%p163_p3, %s422_s16), 15 }
   0xe   : > { %s423_s21 = sshll.u32 %s575_s16, 2 }
   0xf   : > { %s166_s24 = scalar_lea.vmem %s570_s0, %s423_s21  ;;  %468 = vmatpush3.bf16.msra.mxu0 %v493_v2  ;;  %482 = vmatpush3.bf16.msra.mxu1 %v493_v2  ;;  %s172_s29 = scalar_lea.vmem %s573_s3, %s423_s21 }
  0x10   : > { %v494_v3 = vld [vmem:[%s166_s24] sm:$0xff]   ;;  %v495_v4 = vld [vmem:[%s166_s24 + $0x10] sm:$0xff]   ;;  %v496_v5 = vld [vmem:[%s166_s24 + $0x8] sm:$0xff]  }
  0x11   : > { %469 = vmatprep.mubr.msk.bf16.mxu0 %vm234_vm0, %v494_v3  ;;  %473 = vmatprep.mubr.msk.bf16.mxu1 %vm234_vm0, %v495_v4  ;;  %v497_v6 = vld [vmem:[%s166_s24 + $0x18] sm:$0xff]  }
  0x12   : > { %470 = vmatmul.mubr.msk.bf16.vlgmr.msra.gmra.mrb[0].mxu0 %vm234_vm0, %v496_v5  ;;  %474 = vmatmul.mubr.msk.bf16.vlgmr.msra.gmra.mrb[0].mxu1 %vm234_vm0, %v497_v6 }
  0xe5   : > { %v471_v8 = vpop.f32.mrb[0].mxu0  ;;  %v475_v9 = vpop.f32.mrb[0].mxu1 }
  0xe6   : > { %v290_v10 = vadd.f32 %v471_v8, %v426_v7  ;;  %v306_v11 = vadd.f32 %v475_v9, %v426_v7  ;;  %v281_v12 = vpop.f32.mrb[1].mxu0  ;;  %v297_v13 = vpop.f32.mrb[1].mxu1 }
  0xe7   : > { %v282_v14 = vadd.f32 %v426_v7, %v281_v12  ;;  %v298_v15 = vadd.f32 %v426_v7, %v297_v13  ;;  %v472_v16 = vpop.f32.mrb[2].mxu0  ;;  %v476_v17 = vpop.f32.mrb[2].mxu1 }
  0xe8   : > { %v314_v18 = vmax.f32 %v290_v10, 0.0  ;;  %v318_v19 = vmax.f32 %v306_v11, 0.0  ;;  %v293_v20 = vadd.f32 %v472_v16, %v426_v7  ;;  %v309_v21 = vadd.f32 %v476_v17, %v426_v7  ;;  %v284_v22 = vpop.f32.mrb[3].mxu0  ;;  %v300_v23 = vpop.f32.mrb[3].mxu1 }
  0xe9   : > { %v312_v24 = vmax.f32 %v282_v14, 0.0  ;;  %v316_v25 = vmax.f32 %v298_v15, 0.0  ;;  %v285_v26 = vadd.f32 %v426_v7, %v284_v22  ;;  %v301_v27 = vadd.f32 %v426_v7, %v300_v23 }
  0xea   : > { %v450_v28 = vpack.c.bf16 %v314_v18, %v314_v18  ;;  %v454_v29 = vpack.c.bf16 %v318_v19, %v318_v19  ;;  %v315_v30 = vmax.f32 %v293_v20, 0.0  ;;  %v319_v31 = vmax.f32 %v309_v21, 0.0 }
  0xeb   : > { %v448_v32 = vpack.c.bf16 %v312_v24, %v312_v24  ;;  %v452_v33 = vpack.c.bf16 %v316_v25, %v316_v25  ;;  %v313_v34 = vmax.f32 %v285_v26, 0.0  ;;  %v317_v35 = vmax.f32 %v301_v27, 0.0 }
  0xec   : > { %355 = vst.msk [vmem:[%s172_s29 + $0x8] sm:$0xf] %vm352_vm1, %v450_v28  ;;  %359 = vst.msk [vmem:[%s172_s29 + $0x18] sm:$0xf] %vm352_vm1, %v454_v29  ;;  %v451_v36 = vpack.c.bf16 %v315_v30, %v315_v30  ;;  %v455_v37 = vpack.c.bf16 %v319_v31, %v319_v31 }
  0xed   : > { %353 = vst.msk [vmem:[%s172_s29] sm:$0xf] %vm352_vm1, %v448_v32  ;;  %357 = vst.msk [vmem:[%s172_s29 + $0x10] sm:$0xf] %vm352_vm1, %v452_v33  ;;  %v449_v38 = vpack.c.bf16 %v313_v34, %v313_v34  ;;  %v453_v39 = vpack.c.bf16 %v317_v35, %v317_v35 }
  0xee   : > { %356 = vst.msk [vmem:[%s172_s29 + $0xc] sm:$0xf] %vm352_vm1, %v451_v36  ;;  %360 = vst.msk [vmem:[%s172_s29 + $0x1c] sm:$0xf] %vm352_vm1, %v455_v37 }
  0xef   : > { %354 = vst.msk [vmem:[%s172_s29 + $0x4] sm:$0xf] %vm352_vm1, %v449_v38  ;;  %358 = vst.msk [vmem:[%s172_s29 + $0x14] sm:$0xf] %vm352_vm1, %v453_v39 }
  0xf0 PF: > { %s13_s12 = sadd.s32 1, %s504_s12  }
  0xf1   : > { %p10_p4 = scmp.ge.s32.totalorder %s13_s12, 4  }
  0xf3   :  { %12 = sbr.rel (!%p10_p4) target bundleno = 1 (0x1), region = 62 }

// kernel: vqvae_forward.17
= control target key start
LH: loop header
LB: loop body
LE: loop exit
PB: predicated region body
PF: predicated region fallthrough
CT: control target
= control target key end

     0   :  { %s548_s12 = smov 0   ;;  %s620_s0 = inlined_call_operand.vmem [shape: bf16[32,256], index: 0, kind: input, shape index: {}]   ;;  %s621_s1 = inlined_call_operand.vmem [shape: bf16[256,32], index: 1, kind: input, shape index: {}]   ;;  %s622_s2 = inlined_call_operand.vmem [shape: f32[1,32], index: 2, kind: input, shape index: {}]   ;;  %s623_s3 = inlined_call_operand.vmem [shape: bf16[32,32], index: 3, kind: output, shape index: {}]  }
   0x1 LB: > { %s435_s13 = sadd.s32 4294967295, %s526_s12   ;;  %p439_p0 = scmp.ge.s32.totalorder %s526_s12, 1  ;;  %s526_s12 = sphi %s548_s12, %s13_s12  }
   0x2   : > { %p139_p1 = scmp.lt.s32.totalorder %s526_s12, 3 }
   0x4   : > { %p140_p2 = pnand %p439_p0, %p139_p1 }
   0x5   : > { %v501_v0 = vld [vmem:[%s621_s1 + $0x40] sm:$0xff] (!%p140_p2)   ;;  %s440_s16 = sshll.u32 (!%p140_p2), %s435_s13, 1  ;;  %v503_v2 = vld [vmem:[%s621_s1 + $0x48] sm:$0xff] (!%p140_p2)   ;;  %v505_v4 = vld [vmem:[%s621_s1 + $0x50] sm:$0xff] (!%p140_p2)   ;;  %vm376_vm0 = vcmask (!%p140_p2), 257024  }
   0x6   : > { %143 = sbr.rel (%p140_p2) target bundleno = 262 (0x106), region = 32  ;;  %v502_v1 = vld [vmem:[%s621_s1] sm:$0xff] (!%p140_p2)   ;;  %471 = vmatprep.subr.bf16.mxu0 (!%p140_p2), %v501_v0  ;;  %v504_v3 = vld [vmem:[%s621_s1 + $0x8] sm:$0xff] (!%p140_p2)   ;;  %p165_p3 = scmp.lt.s32.totalorder (!%p140_p2), %s440_s16, 3  ;;  %v506_v5 = vld [vmem:[%s621_s1 + $0x10] sm:$0xff] (!%p140_p2)  }
   0x7   : > { %472 = vmatpush3.bf16.msra.mxu0 (!%p140_p2), %v502_v1  ;;  %v507_v6 = vld [vmem:[%s621_s1 + $0x58] sm:$0xff] (!%p140_p2)   ;;  %v509_v8 = vld [vmem:[%s621_s1 + $0x60] sm:$0xff] (!%p140_p2)   ;;  %v511_v10 = vld [vmem:[%s621_s1 + $0x68] sm:$0xff] (!%p140_p2)  }
   0x8   : > { %473 = vmatprep.subr.bf16.mxu0 (!%p140_p2), %v503_v2  ;;  %v508_v7 = vld [vmem:[%s621_s1 + $0x18] sm:$0xff] (!%p140_p2)   ;;  %v510_v9 = vld [vmem:[%s621_s1 + $0x20] sm:$0xff] (!%p140_p2)   ;;  %v512_v12 = vld [vmem:[%s621_s1 + $0x28] sm:$0xff] (!%p140_p2)  }
   0x9   : > { %v513_v13 = vld [vmem:[%s621_s1 + $0x70] sm:$0xff] (!%p140_p2)   ;;  %v515_v15 = vld [vmem:[%s621_s1 + $0x78] sm:$0xff] (!%p140_p2)   ;;  %v445_v19 = vld [vmem:[%s622_s2] ss:$0 sm:$0xff] (!%p140_p2) }
   0xa   : > { %v514_v14 = vld [vmem:[%s621_s1 + $0x30] sm:$0xff] (!%p140_p2)   ;;  %v516_v16 = vld [vmem:[%s621_s1 + $0x38] sm:$0xff] (!%p140_p2)  }
   0xb   : > { %474 = vmatpush3.bf16.msra.mxu0 (!%p140_p2), %v504_v3 }
   0xc   : > { %475 = vmatprep.subr.bf16.mxu0 (!%p140_p2), %v505_v4 }
   0xd   : > { %s625_s16 = smov (!%p165_p3, %s440_s16), 3 }
   0xe   : > { %s468_s4 = sshll.u32 %s625_s16, 3  ;;  %s444_s28 = sshll.u32 %s625_s16, 2 }
   0xf   : > { %476 = vmatpush3.bf16.msra.mxu0 %v506_v5  ;;  %s169_s9 = scalar_lea.vmem %s620_s0, %s468_s4  ;;  %s175_s4 = scalar_lea.vmem %s623_s3, %s444_s28 }
  0x10   : > { %477 = vmatprep.subr.bf16.mxu0 %v507_v6  ;;  %v519_v11 = vld [vmem:[%s169_s9 + $0x4] ss:$8 sps:$4 sm:$0xff]   ;;  %v517_v17 = vld [vmem:[%s169_s9] ss:$8 sps:$4 sm:$0xff]  }
  0x11   : > { %357 = vmatprep.mubr.bf16.mxu0 %v519_v11 }
  0x13   : > { %478 = vmatpush3.bf16.msra.mxu0 %v508_v7 }
  0x14   : > { %479 = vmatprep.subr.bf16.mxu0 %v509_v8 }
  0x17   : > { %480 = vmatpush3.bf16.msra.mxu0 %v510_v9 }
  0x18   : > { %481 = vmatprep.subr.bf16.mxu0 %v511_v10 }
  0x1b   : > { %482 = vmatpush3.bf16.msra.mxu0 %v512_v12 }
  0x1c   : > { %483 = vmatprep.subr.bf16.mxu0 %v513_v13 }
  0x1f   : > { %484 = vmatpush3.bf16.msra.mxu0 %v514_v14 }
  0x20   : > { %485 = vmatprep.subr.bf16.mxu0 %v515_v15 }
  0x23   : > { %486 = vmatpush3.bf16.msra.mxu0 %v516_v16 }
  0x26   : > { %358 = vmatmul.mubr.bf16.vlgmr.msra.gmra.mrb[0].mxu0 %v517_v17 }
  0xf9   : > { %v487_v18 = vpop.f32.mrb[0].mxu0 }
  0xfa   : > { %v488_v20 = vpop.f32.mrb[1].mxu0 }
  0xfb   : > { %v489_v21 = vadd.f32 %v488_v20, %v487_v18  ;;  %v490_v22 = vpop.f32.mrb[2].mxu0 }
  0xfc   : > { %v491_v23 = vpop.f32.mrb[3].mxu0 }
  0xfd   : > { %v360_v24 = vadd.f32 %v489_v21, %v445_v19  ;;  %v492_v25 = vadd.f32 %v491_v23, %v490_v22 }
  0xff   : > { %v366_v26 = vmax.f32 %v360_v24, 0.0  ;;  %v363_v27 = vadd.f32 %v492_v25, %v445_v19 }
 0x101   : > { %v469_v28 = vpack.c.bf16 %v366_v26, %v366_v26  ;;  %v367_v29 = vmax.f32 %v363_v27, 0.0 }
 0x103   : > { %377 = vst.msk [vmem:[%s175_s4] sm:$0xf] %vm376_vm0, %v469_v28  ;;  %v470_v30 = vpack.c.bf16 %v367_v29, %v367_v29 }
 0x105   : > { %378 = vst.msk [vmem:[%s175_s4 + $0x4] sm:$0xf] %vm376_vm0, %v470_v30 }
 0x106 PF: > { %s13_s12 = sadd.s32 1, %s526_s12  }
 0x107   : > { %p10_p4 = scmp.ge.s32.totalorder %s13_s12, 4  }
 0x109   :  { %12 = sbr.rel (!%p10_p4) target bundleno = 1 (0x1), region = 62 }

// kernel: vqvae_forward.18
= control target key start
LH: loop header
LB: loop body
LE: loop exit
PB: predicated region body
PF: predicated region fallthrough
CT: control target
= control target key end

     0   :  { %s635_s12 = smov 0   ;;  %s713_s0 = inlined_call_operand.vmem [shape: bf16[32,288], index: 0, kind: input, shape index: {}]   ;;  %s714_s1 = inlined_call_operand.vmem [shape: bf16[288,32], index: 1, kind: input, shape index: {}]   ;;  %s715_s2 = inlined_call_operand.vmem [shape: f32[1,32], index: 2, kind: input, shape index: {}]   ;;  %s716_s3 = inlined_call_operand.vmem [shape: bf16[32,32], index: 3, kind: output, shape index: {}]  }
   0x1 LB: > { %s501_s13 = sadd.s32 4294967295, %s611_s12   ;;  %p505_p0 = scmp.ge.s32.totalorder %s611_s12, 1  ;;  %s611_s12 = sphi %s635_s12, %s13_s12  }
   0x2   : > { %p139_p1 = scmp.lt.s32.totalorder %s611_s12, 3 }
   0x4   : > { %p140_p2 = pnand %p505_p0, %p139_p1 }
   0x5   : > { %v583_v0 = vld [vmem:[%s714_s1 + $0x40] sm:$0xff] (!%p140_p2)   ;;  %v613_v2 = vmov (!%p140_p2), 0.0   ;;  %s506_s18 = sshll.u32 (!%p140_p2), %s501_s13, 1  ;;  %v585_v3 = vld [vmem:[%s714_s1 + $0x48] sm:$0xff] (!%p140_p2)   ;;  %v587_v5 = vld [vmem:[%s714_s1 + $0x50] sm:$0xff] (!%p140_p2)   ;;  %vm614_vm0 = vmmov (!%p140_p2), 0  }
   0x6   : > { %143 = sbr.rel (%p140_p2) target bundleno = 262 (0x106), region = 32  ;;  %v584_v1 = vld [vmem:[%s714_s1] sm:$0xff] (!%p140_p2)   ;;  %564 = vmatprep.subr.bf16.mxu1 (!%p140_p2), %v613_v2  ;;  %539 = vmatprep.subr.bf16.mxu0 (!%p140_p2), %v583_v0  ;;  %p165_p3 = scmp.lt.s32.totalorder (!%p140_p2), %s506_s18, 3  ;;  %v586_v4 = vld [vmem:[%s714_s1 + $0x8] sm:$0xff] (!%p140_p2)   ;;  %v588_v6 = vld [vmem:[%s714_s1 + $0x10] sm:$0xff] (!%p140_p2)   ;;  %vm348_vm1 = vcmask (!%p140_p2), 261120  }
   0x7   : > { %540 = vmatpush3.bf16.msra.mxu0 (!%p140_p2), %v584_v1  ;;  %568 = vmatprep.mubr.msk.bf16.mxu1 (!%p140_p2), %vm614_vm0, %v613_v2  ;;  %v589_v7 = vld [vmem:[%s714_s1 + $0x58] sm:$0xff] (!%p140_p2)   ;;  %v591_v9 = vld [vmem:[%s714_s1 + $0x60] sm:$0xff] (!%p140_p2)   ;;  %v593_v12 = vld [vmem:[%s714_s1 + $0x68] sm:$0xff] (!%p140_p2)   ;;  %vm442_vm2 = vcmask (!%p140_p2), 257024  }
   0x8   : > { %541 = vmatprep.subr.bf16.mxu0 (!%p140_p2), %v585_v3  ;;  %v590_v8 = vld [vmem:[%s714_s1 + $0x18] sm:$0xff] (!%p140_p2)   ;;  %v597_v10 = vld [vmem:[%s714_s1 + $0x80] sm:$0xff] (!%p140_p2)   ;;  %v594_v13 = vld [vmem:[%s714_s1 + $0x28] sm:$0xff] (!%p140_p2)  }
   0x9   : > { %v592_v11 = vld [vmem:[%s714_s1 + $0x20] sm:$0xff] (!%p140_p2)   ;;  %565 = vmatpush3.bf16.msra.mxu1 (!%p140_p2), %v597_v10  ;;  %v603_v15 = vld [vmem:[%s714_s1 + $0x88] sm:$0xff] (!%p140_p2)   ;;  %v595_v16 = vld [vmem:[%s714_s1 + $0x70] sm:$0xff] (!%p140_p2)  }
   0xa   : > { %566 = vmatprep.subr.bf16.mxu1 (!%p140_p2), %v613_v2  ;;  %v596_v18 = vld [vmem:[%s714_s1 + $0x30] sm:$0xff] (!%p140_p2)   ;;  %v598_v19 = vld [vmem:[%s714_s1 + $0x78] sm:$0xff] (!%p140_p2)   ;;  %v510_v28 = vld [vmem:[%s715_s2] ss:$0 sm:$0xff] (!%p140_p2) }
   0xb   : > { %542 = vmatpush3.bf16.msra.mxu0 (!%p140_p2), %v586_v4  ;;  %v599_v20 = vld [vmem:[%s714_s1 + $0x38] sm:$0xff] (!%p140_p2)  }
   0xc   : > { %543 = vmatprep.subr.bf16.mxu0 (!%p140_p2), %v587_v5 }
   0xd   : > { %s718_s18 = smov (!%p165_p3, %s506_s18), 3  ;;  %567 = vmatpush3.bf16.msra.mxu1 %v603_v15 }
   0xe   : > { %s572_s4 = smul.u32 12, %s718_s18  ;;  %s509_s5 = sshll.u32 %s718_s18, 2 }
   0xf   : > { %544 = vmatpush3.bf16.msra.mxu0 %v588_v6  ;;  %s175_s8 = scalar_lea.vmem %s716_s3, %s509_s5 }
  0x10   : > { %545 = vmatprep.subr.bf16.mxu0 %v589_v7  ;;  %s169_s14 = scalar_lea.vmem %s713_s0, %s572_s4 }
  0x11   : > { %v602_v14 = vld [vmem:[%s169_s14 + $0x4] ss:$12 sps:$4 sm:$0xff]   ;;  %v604_v17 = vld [vmem:[%s169_s14 + $0x8] ss:$12 sps:$4 sm:$0xff]   ;;  %v600_v21 = vld [vmem:[%s169_s14] ss:$12 sps:$4 sm:$0xff]  }
  0x12   : > { %384 = vmatprep.mubr.bf16.mxu0 %v602_v14  ;;  %569 = vmatmul.mubr.msk.bf16.vlgmr.msra.gmra.mrb[0].mxu1 %vm348_vm1, %v604_v17 }
  0x13   : > { %546 = vmatpush3.bf16.msra.mxu0 %v590_v8 }
  0x14   : > { %547 = vmatprep.subr.bf16.mxu0 %v591_v9 }
  0x17   : > { %548 = vmatpush3.bf16.msra.mxu0 %v592_v11 }
  0x18   : > { %549 = vmatprep.subr.bf16.mxu0 %v593_v12 }
  0x1b   : > { %550 = vmatpush3.bf16.msra.mxu0 %v594_v13 }
  0x1c   : > { %551 = vmatprep.subr.bf16.mxu0 %v595_v16 }
  0x1f   : > { %552 = vmatpush3.bf16.msra.mxu0 %v596_v18 }
  0x20   : > { %553 = vmatprep.subr.bf16.mxu0 %v598_v19 }
  0x23   : > { %554 = vmatpush3.bf16.msra.mxu0 %v599_v20 }
  0x26   : > { %385 = vmatmul.mubr.bf16.vlgmr.msra.gmra.mrb[0].mxu0 %v600_v21 }
  0xe5   : > { %v427_v22 = vpop.f32.mrb[0].mxu1 }
  0xe6   : > { %v570_v23 = vpop.f32.mrb[1].mxu1 }
  0xe7   : > { %v430_v24 = vpop.f32.mrb[2].mxu1 }
  0xe8   : > { %v571_v25 = vpop.f32.mrb[3].mxu1 }
  0xf9   : > { %v555_v26 = vpop.f32.mrb[0].mxu0 }
  0xfa   : > { %v556_v27 = vpop.f32.mrb[1].mxu0 }
  0xfb   : > { %v557_v29 = vadd.f32 %v556_v27, %v555_v26  ;;  %v558_v30 = vpop.f32.mrb[2].mxu0 }
  0xfc   : > { %v559_v31 = vpop.f32.mrb[3].mxu0 }
  0xfd   : > { %v387_v32 = vadd.f32 %v557_v29, %v510_v28  ;;  %v560_v33 = vadd.f32 %v559_v31, %v558_v30 }
  0xff   : > { %v428_v34 = vadd.f32 %v427_v22, %v387_v32  ;;  %v390_v35 = vadd.f32 %v560_v33, %v510_v28 }
 0x101   : > { %v537_v36 = vpack.c.bf16 %v428_v34, %v428_v34  ;;  %v431_v37 = vadd.f32 %v430_v24, %v390_v35 }
 0x103   : > { %443 = vst.msk [vmem:[%s175_s8] sm:$0xf] %vm442_vm2, %v537_v36  ;;  %v538_v38 = vpack.c.bf16 %v431_v37, %v431_v37 }
 0x105   : > { %444 = vst.msk [vmem:[%s175_s8 + $0x4] sm:$0xf] %vm442_vm2, %v538_v38 }
 0x106 PF: > { %s13_s12 = sadd.s32 1, %s611_s12  }
 0x107   : > { %p10_p4 = scmp.ge.s32.totalorder %s13_s12, 4  }
 0x109   :  { %12 = sbr.rel (!%p10_p4) target bundleno = 1 (0x1), region = 62 }

// kernel: vqvae_forward.19
= control target key start
LH: loop header
LB: loop body
LE: loop exit
PB: predicated region body
PF: predicated region fallthrough
CT: control target
= control target key end

     0   :  { %s637_s12 = smov 0   ;;  %s715_s0 = inlined_call_operand.vmem [shape: bf16[32,288], index: 0, kind: input, shape index: {}]   ;;  %s716_s1 = inlined_call_operand.vmem [shape: bf16[288,8], index: 1, kind: input, shape index: {}]   ;;  %s717_s2 = inlined_call_operand.vmem [shape: f32[1,8], index: 2, kind: input, shape index: {}]   ;;  %s718_s3 = inlined_call_operand.vmem [shape: bf16[32,8], index: 3, kind: output, shape index: {}]  }
   0x1 LB: > { %s503_s13 = sadd.s32 4294967295, %s613_s12   ;;  %p507_p0 = scmp.ge.s32.totalorder %s613_s12, 1  ;;  %s613_s12 = sphi %s637_s12, %s13_s12  }
   0x2   : > { %p139_p1 = scmp.lt.s32.totalorder %s613_s12, 3 }
   0x4   : > { %p140_p2 = pnand %p507_p0, %p139_p1 }
   0x5   : > { %v585_v0 = vld [vmem:[%s716_s1 + $0x40] sm:$0xff] (!%p140_p2)   ;;  %v615_v2 = vmov (!%p140_p2), 0.0   ;;  %s508_s18 = sshll.u32 (!%p140_p2), %s503_s13, 1  ;;  %v587_v3 = vld [vmem:[%s716_s1 + $0x48] sm:$0xff] (!%p140_p2)   ;;  %v589_v5 = vld [vmem:[%s716_s1 + $0x50] sm:$0xff] (!%p140_p2)   ;;  %vm616_vm0 = vmmov (!%p140_p2), 0  }
   0x6   : > { %143 = sbr.rel (%p140_p2) target bundleno = 264 (0x108), region = 32  ;;  %v586_v1 = vld [vmem:[%s716_s1] sm:$0xff] (!%p140_p2)   ;;  %566 = vmatprep.subr.bf16.mxu1 (!%p140_p2), %v615_v2  ;;  %541 = vmatprep.subr.bf16.mxu0 (!%p140_p2), %v585_v0  ;;  %p165_p3 = scmp.lt.s32.totalorder (!%p140_p2), %s508_s18, 3  ;;  %v588_v4 = vld [vmem:[%s716_s1 + $0x8] sm:$0xff] (!%p140_p2)   ;;  %v590_v6 = vld [vmem:[%s716_s1 + $0x10] sm:$0xff] (!%p140_p2)   ;;  %vm348_vm1 = vcmask (!%p140_p2), 261120  }
   0x7   : > { %542 = vmatpush3.bf16.msra.mxu0 (!%p140_p2), %v586_v1  ;;  %570 = vmatprep.mubr.msk.bf16.mxu1 (!%p140_p2), %vm616_vm0, %v615_v2  ;;  %v591_v7 = vld [vmem:[%s716_s1 + $0x58] sm:$0xff] (!%p140_p2)   ;;  %v593_v9 = vld [vmem:[%s716_s1 + $0x60] sm:$0xff] (!%p140_p2)   ;;  %v595_v12 = vld [vmem:[%s716_s1 + $0x68] sm:$0xff] (!%p140_p2)   ;;  %vm444_vm2 = vcmask (!%p140_p2), 60416  }
   0x8   : > { %543 = vmatprep.subr.bf16.mxu0 (!%p140_p2), %v587_v3  ;;  %v592_v8 = vld [vmem:[%s716_s1 + $0x18] sm:$0xff] (!%p140_p2)   ;;  %v599_v10 = vld [vmem:[%s716_s1 + $0x80] sm:$0xff] (!%p140_p2)   ;;  %v596_v13 = vld [vmem:[%s716_s1 + $0x28] sm:$0xff] (!%p140_p2)  }
   0x9   : > { %v594_v11 = vld [vmem:[%s716_s1 + $0x20] sm:$0xff] (!%p140_p2)   ;;  %567 = vmatpush3.bf16.msra.mxu1 (!%p140_p2), %v599_v10  ;;  %v605_v15 = vld [vmem:[%s716_s1 + $0x88] sm:$0xff] (!%p140_p2)   ;;  %v597_v16 = vld [vmem:[%s716_s1 + $0x70] sm:$0xff] (!%p140_p2)  }
   0xa   : > { %568 = vmatprep.subr.bf16.mxu1 (!%p140_p2), %v615_v2  ;;  %v598_v18 = vld [vmem:[%s716_s1 + $0x30] sm:$0xff] (!%p140_p2)   ;;  %v600_v19 = vld [vmem:[%s716_s1 + $0x78] sm:$0xff] (!%p140_p2)   ;;  %v512_v28 = vld [vmem:[%s717_s2] ss:$0 sm:$0xff] (!%p140_p2) }
   0xb   : > { %544 = vmatpush3.bf16.msra.mxu0 (!%p140_p2), %v588_v4  ;;  %v601_v20 = vld [vmem:[%s716_s1 + $0x38] sm:$0xff] (!%p140_p2)  }
   0xc   : > { %545 = vmatprep.subr.bf16.mxu0 (!%p140_p2), %v589_v5 }
   0xd   : > { %s720_s18 = smov (!%p165_p3, %s508_s18), 3  ;;  %569 = vmatpush3.bf16.msra.mxu1 %v605_v15 }
   0xe   : > { %s574_s4 = smul.u32 12, %s720_s18  ;;  %s511_s5 = sshll.u32 %s720_s18, 2 }
   0xf   : > { %546 = vmatpush3.bf16.msra.mxu0 %v590_v6  ;;  %s175_s8 = scalar_lea.vmem %s718_s3, %s511_s5 }
  0x10   : > { %547 = vmatprep.subr.bf16.mxu0 %v591_v7  ;;  %s169_s14 = scalar_lea.vmem %s715_s0, %s574_s4 }
  0x11   : > { %v604_v14 = vld [vmem:[%s169_s14 + $0x4] ss:$12 sps:$4 sm:$0xff]   ;;  %v606_v17 = vld [vmem:[%s169_s14 + $0x8] ss:$12 sps:$4 sm:$0xff]   ;;  %v602_v21 = vld [vmem:[%s169_s14] ss:$12 sps:$4 sm:$0xff]  }
  0x12   : > { %384 = vmatprep.mubr.bf16.mxu0 %v604_v14  ;;  %571 = vmatmul.mubr.msk.bf16.vlgmr.msra.gmra.mrb[0].mxu1 %vm348_vm1, %v606_v17 }
  0x13   : > { %548 = vmatpush3.bf16.msra.mxu0 %v592_v8 }
  0x14   : > { %549 = vmatprep.subr.bf16.mxu0 %v593_v9 }
  0x17   : > { %550 = vmatpush3.bf16.msra.mxu0 %v594_v11 }
  0x18   : > { %551 = vmatprep.subr.bf16.mxu0 %v595_v12 }
  0x1b   : > { %552 = vmatpush3.bf16.msra.mxu0 %v596_v13 }
  0x1c   : > { %553 = vmatprep.subr.bf16.mxu0 %v597_v16 }
  0x1f   : > { %554 = vmatpush3.bf16.msra.mxu0 %v598_v18 }
  0x20   : > { %555 = vmatprep.subr.bf16.mxu0 %v600_v19 }
  0x23   : > { %556 = vmatpush3.bf16.msra.mxu0 %v601_v20 }
  0x26   : > { %385 = vmatmul.mubr.bf16.vlgmr.msra.gmra.mrb[0].mxu0 %v602_v21 }
  0xe5   : > { %v427_v22 = vpop.f32.mrb[0].mxu1 }
  0xe6   : > { %v572_v23 = vpop.f32.mrb[1].mxu1 }
  0xe7   : > { %v430_v24 = vpop.f32.mrb[2].mxu1 }
  0xe8   : > { %v573_v25 = vpop.f32.mrb[3].mxu1 }
  0xf9   : > { %v557_v26 = vpop.f32.mrb[0].mxu0 }
  0xfa   : > { %v558_v27 = vpop.f32.mrb[1].mxu0 }
  0xfb   : > { %v559_v29 = vadd.f32 %v558_v27, %v557_v26  ;;  %v560_v30 = vpop.f32.mrb[2].mxu0 }
  0xfc   : > { %v561_v31 = vpop.f32.mrb[3].mxu0 }
  0xfd   : > { %v387_v32 = vadd.f32 %v559_v29, %v512_v28  ;;  %v562_v33 = vadd.f32 %v561_v31, %v560_v30 }
  0xff   : > { %v428_v34 = vadd.f32 %v427_v22, %v387_v32  ;;  %v390_v35 = vadd.f32 %v562_v33, %v512_v28 }
 0x101   : > { %v434_v36 = vmax.f32 %v428_v34, 0.0  ;;  %v431_v37 = vadd.f32 %v430_v24, %v390_v35 }
 0x103   : > { %v539_v38 = vpack.c.bf16 %v434_v36, %v434_v36  ;;  %v435_v39 = vmax.f32 %v431_v37, 0.0 }
 0x105   : > { %445 = vst.msk [vmem:[%s175_s8] sm:$0xf] %vm444_vm2, %v539_v38  ;;  %v540_v40 = vpack.c.bf16 %v435_v39, %v435_v39 }
 0x107   : > { %446 = vst.msk [vmem:[%s175_s8 + $0x4] sm:$0xf] %vm444_vm2, %v540_v40 }
 0x108 PF: > { %s13_s12 = sadd.s32 1, %s613_s12  }
 0x109   : > { %p10_p4 = scmp.ge.s32.totalorder %s13_s12, 4  }
 0x10b   :  { %12 = sbr.rel (!%p10_p4) target bundleno = 1 (0x1), region = 62 }

// kernel: vqvae_forward.20
= control target key start
LH: loop header
LB: loop body
LE: loop exit
PB: predicated region body
PF: predicated region fallthrough
CT: control target
= control target key end

     0   :  { %s373_s12 = smov 0   ;;  %s396_s0 = inlined_call_operand.vmem [shape: bf16[32,8], index: 0, kind: input, shape index: {}]   ;;  %s397_s1 = inlined_call_operand.vmem [shape: bf16[8,32], index: 1, kind: input, shape index: {}]   ;;  %s398_s2 = inlined_call_operand.vmem [shape: f32[1,32], index: 2, kind: input, shape index: {}]   ;;  %s399_s3 = inlined_call_operand.vmem [shape: bf16[32,32], index: 3, kind: output, shape index: {}]  }
   0x1 LB: > { %s306_s13 = sadd.s32 4294967295, %s349_s12   ;;  %p310_p0 = scmp.ge.s32.totalorder %s349_s12, 1  ;;  %s349_s12 = sphi %s373_s12, %s13_s12  }
   0x2   : > { %p138_p1 = scmp.lt.s32.totalorder %s349_s12, 3 }
   0x4   : > { %p139_p2 = pnand %p310_p0, %p138_p1 }
   0x5   : > { %v177_v0 = vld [vmem:[%s397_s1] sm:$0xf] (!%p139_p2)  ;;  %vm194_vm0 = vcmask (!%p139_p2), 1043456   ;;  %s311_s16 = sshll.u32 (!%p139_p2), %s306_s13, 1  ;;  %v351_v1 = vmov (!%p139_p2), 0.0   ;;  %vm352_vm1 = vmmov (!%p139_p2), 0  }
   0x6   : > { %142 = sbr.rel (%p139_p2) target bundleno = 236 (0xec), region = 32  ;;  %326 = vmatprep.subr.bf16.mxu0 (!%p139_p2), %v351_v1  ;;  %v196_v2 = vsel (!%p139_p2), %vm194_vm0, %v177_v0, 0  ;;  %328 = vmatprep.mubr.msk.bf16.mxu0 (!%p139_p2), %vm352_vm1, %v351_v1  ;;  %p163_p3 = scmp.lt.s32.totalorder (!%p139_p2), %s311_s16, 3  ;;  %vm190_vm2 = vcmask (!%p139_p2), 64512   ;;  %v315_v4 = vld [vmem:[%s398_s2] ss:$0 sm:$0xff] (!%p139_p2) }
   0x7   : > { %327 = vmatpush3.bf16.msra.mxu0 (!%p139_p2), %v196_v2  ;;  %vm247_vm3 = vcmask (!%p139_p2), 257024  }
   0xd   : > { %s401_s16 = smov (!%p163_p3, %s311_s16), 3 }
   0xe   : > { %s312_s17 = sshll.u32 %s401_s16, 2 }
   0xf   : > { %s166_s20 = scalar_lea.vmem %s396_s0, %s312_s17  ;;  %s172_s25 = scalar_lea.vmem %s399_s3, %s312_s17 }
  0x10   : > { %v342_v3 = vld [vmem:[%s166_s20] sm:$0xff]  }
  0x11   : > { %329 = vmatmul.mubr.msk.bf16.vlgmr.msra.gmra.mrb[0].mxu0 %vm190_vm2, %v342_v3 }
  0xe4   : > { %v232_v5 = vpop.f32.mrb[0].mxu0 }
  0xe5   : > { %v233_v6 = vadd.f32 %v315_v4, %v232_v5  ;;  %v330_v7 = vpop.f32.mrb[1].mxu0 }
  0xe6   : > { %v235_v8 = vpop.f32.mrb[2].mxu0 }
  0xe7   : > { %v322_v9 = vpack.c.bf16 %v233_v6, %v233_v6  ;;  %v236_v10 = vadd.f32 %v315_v4, %v235_v8  ;;  %v331_v11 = vpop.f32.mrb[3].mxu0 }
  0xe9   : > { %248 = vst.msk [vmem:[%s172_s25] sm:$0xf] %vm247_vm3, %v322_v9  ;;  %v323_v12 = vpack.c.bf16 %v236_v10, %v236_v10 }
  0xeb   : > { %249 = vst.msk [vmem:[%s172_s25 + $0x4] sm:$0xf] %vm247_vm3, %v323_v12 }
  0xec PF: > { %s13_s12 = sadd.s32 1, %s349_s12  }
  0xed   : > { %p10_p4 = scmp.ge.s32.totalorder %s13_s12, 4  }
  0xef   :  { %12 = sbr.rel (!%p10_p4) target bundleno = 1 (0x1), region = 62 }

// kernel: vqvae_forward.23
= control target key start
LH: loop header
LB: loop body
LE: loop exit
PB: predicated region body
PF: predicated region fallthrough
CT: control target
= control target key end

     0   :  { %s379_s12 = smov 0   ;;  %s405_s0 = inlined_call_operand.vmem [shape: bf16[32,32], index: 0, kind: input, shape index: {}]   ;;  %s406_s1 = inlined_call_operand.vmem [shape: bf16[32,8], index: 1, kind: input, shape index: {}]   ;;  %s407_s2 = inlined_call_operand.vmem [shape: f32[1,8], index: 2, kind: input, shape index: {}]   ;;  %s408_s3 = inlined_call_operand.vmem [shape: f32[32,8], index: 3, kind: output, shape index: {}]  }
   0x1 LB: > { %s309_s13 = sadd.s32 4294967295, %s355_s12   ;;  %p313_p0 = scmp.ge.s32.totalorder %s355_s12, 1  ;;  %s355_s12 = sphi %s379_s12, %s13_s12  }
   0x2   : > { %p138_p1 = scmp.lt.s32.totalorder %s355_s12, 3 }
   0x4   : > { %p139_p2 = pnand %p313_p0, %p138_p1 }
   0x5   : > { %v346_v0 = vld [vmem:[%s406_s1] sm:$0xff] (!%p139_p2)   ;;  %v357_v1 = vmov (!%p139_p2), 0.0   ;;  %v347_v2 = vld [vmem:[%s406_s1 + $0x8] sm:$0xff] (!%p139_p2)   ;;  %vm358_vm0 = vmmov (!%p139_p2), 0   ;;  %s314_s18 = sshll.u32 (!%p139_p2), %s309_s13, 1  ;;  %vm205_vm1 = vcmask (!%p139_p2), 261120  }
   0x6   : > { %142 = sbr.rel (%p139_p2) target bundleno = 234 (0xea), region = 32  ;;  %328 = vmatprep.subr.bf16.mxu0 (!%p139_p2), %v357_v1  ;;  %332 = vmatprep.mubr.msk.bf16.mxu0 (!%p139_p2), %vm358_vm0, %v357_v1  ;;  %p163_p3 = scmp.lt.s32.totalorder (!%p139_p2), %s314_s18, 3  ;;  %v318_v4 = vld [vmem:[%s407_s2] ss:$0 sm:$0xff] (!%p139_p2)  ;;  %vm250_vm2 = vcmask (!%p139_p2), 64512  }
   0x7   : > { %329 = vmatpush3.bf16.msra.mxu0 (!%p139_p2), %v346_v0 }
   0x8   : > { %330 = vmatprep.subr.bf16.mxu0 (!%p139_p2), %v357_v1 }
   0xb   : > { %331 = vmatpush3.bf16.msra.mxu0 (!%p139_p2), %v347_v2 }
   0xd   : > { %s410_s18 = smov (!%p163_p3, %s314_s18), 3 }
   0xe   : > { %s315_s19 = sshll.u32 %s410_s18, 2  ;;  %s317_s23 = sshll.u32 %s410_s18, 3 }
   0xf   : > { %s166_s22 = scalar_lea.vmem %s405_s0, %s315_s19  ;;  %s172_s28 = scalar_lea.vmem %s408_s3, %s317_s23 }
  0x10   : > { %v348_v3 = vld [vmem:[%s166_s22] sm:$0xff]  }
  0x11   : > { %333 = vmatmul.mubr.msk.bf16.vlgmr.msra.gmra.mrb[0].mxu0 %vm205_vm1, %v348_v3 }
  0xe4   : > { %v243_v5 = vpop.f32.mrb[0].mxu0 }
  0xe5   : > { %v244_v6 = vadd.f32 %v318_v4, %v243_v5  ;;  %v334_v7 = vpop.f32.mrb[1].mxu0 }
  0xe6   : > { %v246_v8 = vpop.f32.mrb[2].mxu0 }
  0xe7   : > { %251 = vst.msk [vmem:[%s172_s28] sm:$0xff] %vm250_vm2, %v244_v6  ;;  %v247_v9 = vadd.f32 %v318_v4, %v246_v8  ;;  %v335_v10 = vpop.f32.mrb[3].mxu0 }
  0xe9   : > { %252 = vst.msk [vmem:[%s172_s28 + $0x8] sm:$0xff] %vm250_vm2, %v247_v9 }
  0xea PF: > { %s13_s12 = sadd.s32 1, %s355_s12  }
  0xeb   : > { %p10_p4 = scmp.ge.s32.totalorder %s13_s12, 4  }
  0xed   :  { %12 = sbr.rel (!%p10_p4) target bundleno = 1 (0x1), region = 62 }

// kernel: vqvae_forward.24
= control target key start
LH: loop header
LB: loop body
LE: loop exit
PB: predicated region body
PF: predicated region fallthrough
CT: control target
= control target key end

     0   :  { %s740_s18 = smov 0   ;;  %s823_s0 = inlined_call_operand.vmem [shape: f32[32,8], index: 0, kind: input, shape index: {}]   ;;  %s824_s1 = inlined_call_operand.vmem [shape: f32[16,8], index: 1, kind: input, shape index: {}]   ;;  %s825_s2 = inlined_call_operand.vmem [shape: f32[1,16], index: 2, kind: input, shape index: {}]   ;;  %s826_s3 = inlined_call_operand.vmem [shape: f32[32,8], index: 3, kind: output, shape index: {0}]   ;;  %s827_s4 = inlined_call_operand.vmem [shape: f32[2,1,8], index: 4, kind: output, shape index: {1}]   ;;  %s828_s5 = inlined_call_operand.vmem [shape: f32[2,1,16], index: 5, kind: output, shape index: {2}]  }
   0x1 LB: > { %s746_s19 = sadd.s32 4294967295, %s707_s18   ;;  %p643_p0 = scmp.ge.s32.totalorder %s707_s18, 1  ;;  %s707_s18 = sphi %s740_s18, %s16_s18  }
   0x2   : > { %p193_p1 = scmp.lt.s32.totalorder %s707_s18, 3 }
   0x4   : > { %p194_p2 = pnand %p643_p0, %p193_p1 }
   0x5   : > { %v247_v0 = vld [vmem:[%s824_s1] sm:$0xff] (!%p194_p2)  ;;  %v248_v1 = vld [vmem:[%s824_s1 + $0x8] sm:$0xff] (!%p194_p2)  ;;  %vm251_vm0 = vcmask (!%p194_p2), 64512   ;;  %s644_s24 = sshll.u32 (!%p194_p2), %s746_s19, 1  ;;  %vm360_vm2 = vcmask (!%p194_p2), 130048   ;;  %v358_v22 = vlaneseq (!%p194_p2)  ;;  %s657_s6 = sshll.u32 (!%p194_p2), %s746_s19, 4 }
   0x6   : > { %197 = sbr.rel (%p194_p2) target bundleno = 917 (0x395), region = 32  ;;  %v682_v2 = vpack.c.bf16 (!%p194_p2), %v248_v1, %v247_v0  ;;  %vm683_vm1 = vmpackc.low (!%p194_p2), %vm251_vm0, %vm251_vm0  ;;  %p228_p3 = scmp.lt.s32.totalorder (!%p194_p2), %s644_s24, 3  ;;  %v652_v15 = vld [vmem:[%s825_s2] ss:$0 sm:$0xff] (!%p194_p2)  ;;  %v494_v44 = vstv (!%p194_p2), %s657_s6  ;;  %v709_v56 = vmov (!%p194_p2), 0.0   ;;  %vm531_vm11 = vcmask (!%p194_p2), 122880  }
   0x7   : > { %v359_v23 = vand.u32 (!%p194_p2), 127, %v358_v22  ;;  %v491_v43 = vshrl.u32 (!%p194_p2), %v358_v22, 7  ;;  %p239_p4 = scmp.lt.s32.totalorder (!%p194_p2), %s746_s19, 1  ;;  %vm518_vm12 = vcmask (!%p194_p2), 57344  }
   0x8   : > { %684 = vmatprep.subr.msk.bf16.mxu0 (!%p194_p2), %vm683_vm1, %v682_v2  ;;  %689 = vmatprep.subr.bf16.mxu1 (!%p194_p2), %v682_v2 }
   0x9   : > { %687 = vmatpush3.bf16.xpose.msk.msra.mxu0 (!%p194_p2), %vm683_vm1, %v682_v2  ;;  %691 = vmatpush3.bf16.msra.mxu1 (!%p194_p2), %v682_v2  ;;  %v492_v46 = vadd.s32 (!%p194_p2), 8, %v491_v43  ;;  %v495_v50 = vadd.s32 (!%p194_p2), %v494_v44, %v491_v43 }
   0xb   : > { %v496_v53 = vadd.s32 (!%p194_p2), %v494_v44, %v492_v46  ;;  %vm497_vm8 = vcmp.lt.s32.totalorder (!%p194_p2), %v495_v50, 32 }
   0xd   : > { %s830_s24 = smov (!%p228_p3, %s644_s24), 3  ;;  %vm498_vm9 = vcmp.lt.s32.totalorder %v496_v53, 32  ;;  %s832_s19 = smov (!%p239_p4, %s746_s19), 1 }
   0xe   : > { %s645_s25 = sshll.u32 %s830_s24, 3  ;;  %s244_s9 = scalar_lea.vmem %s828_s5, %s832_s19 }
   0xf   : > { %s231_s28 = scalar_lea.vmem %s823_s0, %s645_s25  ;;  %s237_s12 = scalar_lea.vmem %s826_s3, %s645_s25 }
  0x10   : > { %v767_v3 = vld [vmem:[%s231_s28] sm:$0xff]  ;;  %v769_v4 = vld [vmem:[%s231_s28 + $0x8] sm:$0xff]  ;;  %s241_s15 = scalar_lea.vmem %s827_s4, %s832_s19 }
  0x11   : > { %672 = vmatprep.mubr.msk.f32.mxu0 %vm251_vm0, %v767_v3  ;;  %v249_v5 = vmul.f32 %v767_v3, %v767_v3  ;;  %v250_v6 = vmul.f32 %v769_v4, %v769_v4 }
  0x12   : > { %673 = vmatmul.mubr.msk.f32.vlgmr.msra.gmra.mrb[0].mxu0 %vm251_vm0, %v769_v4 }
  0x13   : > { %v252_v7 = vsel %vm251_vm0, %v249_v5, 0.0  ;;  %v255_v8 = vsel %vm251_vm0, %v250_v6, 0.0 }
  0x14   : > { %253 = vadd.xlane.f32.xlu0 %v252_v7 }
  0x18   : > { %256 = vadd.xlane.f32.xlu0 %v255_v8 }
  0xa1   : > { %v254_v9 = vpop.xlane.xlu0 %253 }
  0xa5   : > { %v257_v13 = vpop.xlane.xlu0 %256 }
  0xe5   : > { %v674_v10 = vpop.f32.mrb[0].mxu0 }
  0xe6   : > { %v346_v11 = vmul.f32 2.0, %v674_v10  ;;  %v336_v12 = vpop.f32.mrb[1].mxu0 }
  0xe7   : > { %v345_v14 = vmul.f32 2.0, %v336_v12 }
  0xe8   : > { %v348_v17 = vsub.f32 %v257_v13, %v346_v11 }
  0xe9   : > { %v347_v16 = vsub.f32 %v254_v9, %v345_v14 }
  0xea   : > { %v357_v20 = vadd.f32 %v652_v15, %v348_v17 }
  0xeb   : > { %v356_v18 = vadd.f32 %v652_v15, %v347_v16 }
  0xec   : > { %v364_v21 = vsel %vm360_vm2, %v357_v20, inf }
  0xed   : > { %v361_v19 = vsel %vm360_vm2, %v356_v18, inf }
  0xee   : > { %362 = vmin.xlane.f32.xlu1 %v361_v19 }
  0xf2   : > { %365 = vmin.xlane.f32.xlu1 %v364_v21 }
 0x17b   : > { %v363_v24 = vpop.xlane.xlu1 %362 }
 0x17c   : > { %vm367_vm3 = vcmp.le.f32.partialorder %v356_v18, %v363_v24 }
 0x17d   : > { %v369_v25 = vsel %vm367_vm3, %v359_v23, 16 }
 0x17e   : > { %v371_v26 = vsel %vm360_vm2, %v369_v25, 2147483647 }
 0x17f   : > { %v366_v27 = vpop.xlane.xlu1 %365  ;;  %v373_v28 = vshra.s32 %v371_v26, 16  ;;  %v372_v34 = vand.u32 65535, %v371_v26 }
 0x180   : > { %vm368_vm4 = vcmp.le.f32.partialorder %v357_v20, %v366_v27 }
 0x181   : > { %v370_v29 = vsel %vm368_vm4, %v359_v23, 16  ;;  %v375_v30 = vcvt.s32.f32 %v373_v28  ;;  %v374_v36 = vcvt.s32.f32 %v372_v34 }
 0x182   : > { %v386_v31 = vsel %vm360_vm2, %v370_v29, 2147483647 }
 0x183   : > { %376 = vmin.xlane.f32.xlu0 %v375_v30  ;;  %v388_v32 = vshra.s32 %v386_v31, 16  ;;  %v387_v37 = vand.u32 65535, %v386_v31 }
 0x185   : > { %v390_v33 = vcvt.s32.f32 %v388_v32  ;;  %v389_v40 = vcvt.s32.f32 %v387_v37 }
 0x187   : > { %391 = vmin.xlane.f32.xlu1 %v390_v33 }
 0x210   : > { %v377_v35 = vpop.xlane.xlu0 %376 }
 0x211   : > { %vm378_vm5 = vcmp.eq.f32.partialorder %v375_v30, %v377_v35  ;;  %v383_v42 = vcvt.f32.s32 %v377_v35 }
 0x212   : > { %v379_v38 = vsel %vm378_vm5, %v374_v36, inf }
 0x213   : > { %380 = vmin.xlane.f32.xlu0 %v379_v38  ;;  %v384_v47 = vshll.u32 %v383_v42, 16 }
 0x214   : > { %v392_v39 = vpop.xlane.xlu1 %391 }
 0x215   : > { %vm393_vm6 = vcmp.eq.f32.partialorder %v390_v33, %v392_v39  ;;  %v398_v48 = vcvt.f32.s32 %v392_v39 }
 0x216   : > { %v394_v41 = vsel %vm393_vm6, %v389_v40, inf }
 0x217   : > { %395 = vmin.xlane.f32.xlu1 %v394_v41  ;;  %v399_v54 = vshll.u32 %v398_v48, 16 }
 0x2a0   : > { %v381_v45 = vpop.xlane.xlu0 %380 }
 0x2a1   : > { %v382_v49 = vcvt.f32.s32 %v381_v45 }
 0x2a3   : > { %v385_v51 = vadd.s32 %v384_v47, %v382_v49 }
 0x2a4   : > { %v396_v52 = vpop.xlane.xlu1 %395 }
 0x2a5   : > { %v397_v55 = vcvt.f32.s32 %v396_v52  ;;  %vm401_vm7 = vcmp.eq.s32.totalorder %v359_v23, %v385_v51 }
 0x2a6   : > { %v653_v57 = vsel %vm401_vm7, 1.0, %v709_v56 }
 0x2a7   : > { %v400_v58 = vadd.s32 %v399_v54, %v397_v55  ;;  %679 = vmatprep.mubr.msk.f32.mxu1 %vm360_vm2, %v653_v57  ;;  %v520_v59 = vsel %vm497_vm8, %v653_v57, 0.0 }
 0x2a8   : > { %v522_v62 = vsel %vm360_vm2, %v520_v59, 0.0 }
 0x2a9   : > { %vm402_vm10 = vcmp.eq.s32.totalorder %v359_v23, %v400_v58 }
 0x2aa   : > { %v654_v60 = vsel %vm402_vm10, 1.0, %v709_v56 }
 0x2ab   : > { %v521_v61 = vsel %vm498_vm9, %v654_v60, 0.0  ;;  %680 = vmatmul.mubr.msk.f32.vlgmr.msra.gmra.mrb[0].mxu1 %vm360_vm2, %v654_v60 }
 0x2ac   : > { %v523_v63 = vsel %vm360_vm2, %v521_v61, 0.0 }
 0x2ad   : > { %v524_v0 = vadd.f32 %v523_v63, %v522_v62 }
 0x2af   : > { %v525_v1 = vrot.slane %v524_v0, 4 }
 0x2b1   : > { %v526_v2 = vadd.f32 %v525_v1, %v524_v0 }
 0x2b3   : > { %v527_v5 = vrot.slane %v526_v2, 2 }
 0x2b5   : > { %v528_v6 = vadd.f32 %v527_v5, %v526_v2 }
 0x2b7   : > { %v529_v7 = vrot.slane %v528_v6, 1 }
 0x2b9   : > { %v530_v8 = vadd.f32 %v529_v7, %v528_v6 }
 0x2bb   : > { %532 = vst.msk [vmem:[%s244_s9] sm:$0x1] %vm531_vm11, %v530_v8 }
 0x37e   : > { %v681_v9 = vpop.f32.mrb[0].mxu1 }
 0x37f   : > { %v500_v10 = vsub.f32 %v681_v9, %v769_v4  ;;  %v479_v11 = vpop.f32.mrb[1].mxu1  ;;  %489 = vst.msk [vmem:[%s237_s12 + $0x8] sm:$0xff] %vm251_vm0, %v681_v9 }
 0x380   : > { %488 = vst.msk [vmem:[%s237_s12] sm:$0xff] %vm251_vm0, %v479_v11  ;;  %v499_v12 = vsub.f32 %v479_v11, %v767_v3 }
 0x381   : > { %v506_v13 = vsel %vm498_vm9, %v500_v10, 0.0 }
 0x382   : > { %v508_v14 = vmul.f32 %v506_v13, %v506_v13  ;;  %v505_v15 = vsel %vm497_vm8, %v499_v12, 0.0 }
 0x383   : > { %v507_v16 = vmul.f32 %v505_v15, %v505_v15 }
 0x384   : > { %v510_v17 = vsel %vm251_vm0, %v508_v14, 0.0 }
 0x385   : > { %v509_v18 = vsel %vm251_vm0, %v507_v16, 0.0 }
 0x386   : > { %v511_v19 = vadd.f32 %v510_v17, %v509_v18 }
 0x388   : > { %v512_v4 = vrot.slane %v511_v19, 4 }
 0x38a   : > { %v513_v20 = vadd.f32 %v512_v4, %v511_v19 }
 0x38c   : > { %v514_v21 = vrot.slane %v513_v20, 2 }
 0x38e   : > { %v515_v22 = vadd.f32 %v514_v21, %v513_v20 }
 0x390   : > { %v516_v23 = vrot.slane %v515_v22, 1 }
 0x392   : > { %v517_v3 = vadd.f32 %v516_v23, %v515_v22 }
 0x394   : > { %519 = vst.msk [vmem:[%s241_s15] sm:$0x1] %vm518_vm12, %v517_v3 }
 0x395 PF: > { %s16_s18 = sadd.s32 1, %s707_s18  }
 0x396   : > { %p13_p5 = scmp.ge.s32.totalorder %s16_s18, 4  }
 0x398   :  { %15 = sbr.rel (!%p13_p5) target bundleno = 1 (0x1), region = 86 }

// kernel: vqvae_forward.25
= control target key start
LH: loop header
LB: loop body
LE: loop exit
PB: predicated region body
PF: predicated region fallthrough
CT: control target
= control target key end

     0   :  { %s430_s12 = smov 0   ;;  %s465_s0 = inlined_call_operand.vmem [shape: bf16[32,72], index: 0, kind: input, shape index: {}]   ;;  %s466_s1 = inlined_call_operand.vmem [shape: bf16[72,32], index: 1, kind: input, shape index: {}]   ;;  %s467_s2 = inlined_call_operand.vmem [shape: f32[1,32], index: 2, kind: input, shape index: {}]   ;;  %s468_s3 = inlined_call_operand.vmem [shape: bf16[32,32], index: 3, kind: output, shape index: {}]  }
   0x1 LB: > { %s341_s13 = sadd.s32 4294967295, %s406_s12   ;;  %p345_p0 = scmp.ge.s32.totalorder %s406_s12, 1  ;;  %s406_s12 = sphi %s430_s12, %s13_s12  }
   0x2   : > { %p138_p1 = scmp.lt.s32.totalorder %s406_s12, 3 }
   0x4   : > { %p139_p2 = pnand %p345_p0, %p138_p1 }
   0x5   : > { %v394_v0 = vld [vmem:[%s466_s1] sm:$0xff] (!%p139_p2)   ;;  %v408_v1 = vmov (!%p139_p2), 0.0   ;;  %v395_v2 = vld [vmem:[%s466_s1 + $0x8] sm:$0xff] (!%p139_p2)   ;;  %vm409_vm0 = vmmov (!%p139_p2), 0   ;;  %s346_s18 = sshll.u32 (!%p139_p2), %s341_s13, 1  ;;  %v396_v3 = vld [vmem:[%s466_s1 + $0x10] sm:$0xff] (!%p139_p2)  }
   0x6   : > { %142 = sbr.rel (%p139_p2) target bundleno = 245 (0xf5), region = 32  ;;  %370 = vmatprep.subr.bf16.mxu0 (!%p139_p2), %v408_v1  ;;  %380 = vmatprep.mubr.msk.bf16.mxu0 (!%p139_p2), %vm409_vm0, %v408_v1  ;;  %p163_p3 = scmp.lt.s32.totalorder (!%p139_p2), %s346_s18, 3  ;;  %v397_v4 = vld [vmem:[%s466_s1 + $0x18] sm:$0xff] (!%p139_p2)   ;;  %v398_v5 = vld [vmem:[%s466_s1 + $0x20] ss:$0 sps:$4 sm:$0xff] (!%p139_p2)   ;;  %vm229_vm1 = vcmask (!%p139_p2), 1043456  }
   0x7   : > { %371 = vmatpush3.bf16.msra.mxu0 (!%p139_p2), %v394_v0  ;;  %v231_v6 = vsel (!%p139_p2), %vm229_vm1, %v398_v5, 0  ;;  %vm225_vm2 = vcmask (!%p139_p2), 588800   ;;  %v350_v8 = vld [vmem:[%s467_s2] ss:$0 sm:$0xff] (!%p139_p2)  ;;  %vm282_vm3 = vcmask (!%p139_p2), 257024  }
   0x8   : > { %372 = vmatprep.subr.bf16.mxu0 (!%p139_p2), %v408_v1 }
   0xb   : > { %373 = vmatpush3.bf16.msra.mxu0 (!%p139_p2), %v395_v2 }
   0xc   : > { %374 = vmatprep.subr.bf16.mxu0 (!%p139_p2), %v408_v1 }
   0xd   : > { %s470_s18 = smov (!%p163_p3, %s346_s18), 3 }
   0xe   : > { %s347_s21 = sshll.u32 %s470_s18, 2 }
   0xf   : > { %s166_s24 = scalar_lea.vmem %s465_s0, %s347_s21  ;;  %375 = vmatpush3.bf16.msra.mxu0 %v396_v3  ;;  %s172_s6 = scalar_lea.vmem %s468_s3, %s347_s21 }
  0x10   : > { %376 = vmatprep.subr.bf16.mxu0 %v408_v1  ;;  %v399_v7 = vld [vmem:[%s166_s24] sm:$0xff]  }
  0x13   : > { %377 = vmatpush3.bf16.msra.mxu0 %v397_v4 }
  0x14   : > { %378 = vmatprep.subr.bf16.mxu0 %v408_v1 }
  0x17   : > { %379 = vmatpush3.bf16.msra.mxu0 %v231_v6 }
  0x1a   : > { %381 = vmatmul.mubr.msk.bf16.vlgmr.msra.gmra.mrb[0].mxu0 %vm225_vm2, %v399_v7 }
  0xed   : > { %v267_v9 = vpop.f32.mrb[0].mxu0 }
  0xee   : > { %v268_v10 = vadd.f32 %v350_v8, %v267_v9  ;;  %v382_v11 = vpop.f32.mrb[1].mxu0 }
  0xef   : > { %v270_v12 = vpop.f32.mrb[2].mxu0 }
  0xf0   : > { %v362_v13 = vpack.c.bf16 %v268_v10, %v268_v10  ;;  %v271_v14 = vadd.f32 %v350_v8, %v270_v12  ;;  %v383_v15 = vpop.f32.mrb[3].mxu0 }
  0xf2   : > { %283 = vst.msk [vmem:[%s172_s6] sm:$0xf] %vm282_vm3, %v362_v13  ;;  %v363_v16 = vpack.c.bf16 %v271_v14, %v271_v14 }
  0xf4   : > { %284 = vst.msk [vmem:[%s172_s6 + $0x4] sm:$0xf] %vm282_vm3, %v363_v16 }
  0xf5 PF: > { %s13_s12 = sadd.s32 1, %s406_s12  }
  0xf6   : > { %p10_p4 = scmp.ge.s32.totalorder %s13_s12, 4  }
  0xf8   :  { %12 = sbr.rel (!%p10_p4) target bundleno = 1 (0x1), region = 62 }

// kernel: vqvae_forward.30
= control target key start
LH: loop header
LB: loop body
LE: loop exit
PB: predicated region body
PF: predicated region fallthrough
CT: control target
= control target key end

     0   :  { %s862_s12 = smov 0   ;;  %s864_s13 = smov 0   ;;  %s989_s0 = inlined_call_operand.vmem [shape: bf16[50,128], index: 0, kind: input, shape index: {}]   ;;  %s990_s1 = inlined_call_operand.vmem [shape: bf16[128,64], index: 1, kind: input, shape index: {}]   ;;  %s991_s2 = inlined_call_operand.vmem [shape: f32[1,64], index: 2, kind: input, shape index: {}]   ;;  %s992_s3 = inlined_call_operand.vmem [shape: bf16[50,64], index: 3, kind: output, shape index: {}]  }
   0x1   :  { %s866_s14 = smov 0  }
   0x2 LB: > { %s875_s15 = sadd.s32 4294967295, %s808_s14   ;;  %s877_s16 = sadd.s32 1, %s808_s14   ;;  %s808_s14 = sphi %s866_s14, %s999_s14   ;;  %s804_s13 = sphi %s864_s13, %s998_s13   ;;  %s800_s12 = sphi %s862_s12, %s997_s12  }
   0x3   : > { %s85_s17 = ssub.s32 %s808_s14, %s877_s16  ;;  %s88_s18 = sadd.s32 1, %s804_s13 }
   0x4   : > { %p86_p0 = scmp.eq.s32.totalorder %s85_s17, 0  ;;  %p98_p1 = scmp.ne.s32.totalorder %s804_s13, %s800_s12 }
   0x5   : > { %p99_p2 = scmp.eq.s32.totalorder %s875_s15, 1  ;;  %p583_p3 = scmp.ge.s32.totalorder %s808_s14, 1 }
   0x6   : > { %s885_s19 = scalar_select %p86_p0, %s804_s13, %s88_s18  }
   0x7   : > { %p887_p4 = por %p99_p2, %p98_p1  ;;  %p146_p5 = scmp.lt.s32.totalorder %s808_s14, 3 }
   0x9   : > { %p147_p6 = pnand %p583_p3, %p146_p5 }
   0xa   : > { %v744_v0 = vld [vmem:[%s990_s1] sm:$0xff] (!%p147_p6)   ;;  %s895_s23 = sshll.u32 (!%p147_p6), %s875_s15, 2  ;;  %v745_v1 = vld [vmem:[%s990_s1 + $0x8] sm:$0xff] (!%p147_p6)   ;;  %v746_v2 = vld [vmem:[%s990_s1 + $0x10] sm:$0xff] (!%p147_p6)   ;;  %s170_s22 = sand.u32 (!%p147_p6), 1, %s800_s12   ;;  %vm349_vm0 = vcmask (!%p147_p6), 519168  }
   0xb   : > { %150 = sbr.rel (%p147_p6) target bundleno = 318 (0x13e), region = 32  ;;  %p178_p7 = scmp.lt.s32.totalorder (!%p147_p6), %s895_s23, 6  ;;  %636 = vmatprep.subr.bf16.mxu0 (!%p147_p6), %v744_v0  ;;  %v747_v3 = vld [vmem:[%s990_s1 + $0x18] sm:$0xff] (!%p147_p6)   ;;  %v748_v5 = vld [vmem:[%s990_s1 + $0x20] sm:$0xff] (!%p147_p6)   ;;  %v749_v6 = vld [vmem:[%s990_s1 + $0x28] sm:$0xff] (!%p147_p6)  }
   0xc   : > { %637 = vmatpush3.bf16.msra.mxu0 (!%p147_p6), %v744_v0  ;;  %v750_v7 = vld [vmem:[%s990_s1 + $0x30] sm:$0xff] (!%p147_p6)   ;;  %v751_v8 = vld [vmem:[%s990_s1 + $0x38] sm:$0xff] (!%p147_p6)   ;;  %v587_v10 = vld [vmem:[%s991_s2] ss:$0 sm:$0xff] (!%p147_p6) }
   0xd   : > { %638 = vmatprep.subr.bf16.mxu0 (!%p147_p6), %v745_v1 }
  0x10   : > { %639 = vmatpush3.bf16.msra.mxu0 (!%p147_p6), %v745_v1 }
  0x11   : > { %640 = vmatprep.subr.bf16.mxu0 (!%p147_p6), %v746_v2 }
  0x12   : > { %s179_s26 = scalar_select %p178_p7, %s895_s23, 6 }
  0x13   : > { %s362_s27 = ssub.s32 (%p887_p4), 7, %s895_s23  ;;  %s623_s28 = sshll.u32 (%p887_p4), %s875_s15, 4 }
  0x14   : > { %s586_s29 = sshll.u32 %s179_s26, 2  ;;  %641 = vmatpush3.bf16.msra.mxu0 %v746_v2  ;;  %s584_s26 = sshll.u32 %s170_s22, 4 }
  0x15   : > { %s181_s5 = scalar_lea.vmem %s989_s0, %s586_s29  ;;  %642 = vmatprep.subr.bf16.mxu0 %v747_v3  ;;  %s927_s12 = scalar_lea.vmem [#allocation2], %s584_s26  }
  0x16   : > { %v752_v4 = vld [vmem:[%s181_s5] sm:$0xff]   ;;  %v753_v9 = vld [vmem:[%s181_s5 + $0x8] sm:$0xff]   ;;  %p363_p8 = scmp.lt.s32.totalorder (%p887_p4), %s362_s27, 4  ;;  %s940_s4 = scalar_lea.vmem (%p887_p4), %s992_s3, %s623_s28  }
  0x17   : > { %652 = vmatprep.mubr.bf16.mxu0 %v752_v4 }
  0x18   : > { %643 = vmatpush3.bf16.msra.mxu0 %v747_v3 }
  0x19   : > { %644 = vmatprep.subr.bf16.mxu0 %v748_v5 }
  0x1c   : > { %645 = vmatpush3.bf16.msra.mxu0 %v748_v5 }
  0x1d   : > { %646 = vmatprep.subr.bf16.mxu0 %v749_v6 }
  0x20   : > { %647 = vmatpush3.bf16.msra.mxu0 %v749_v6 }
  0x21   : > { %648 = vmatprep.subr.bf16.mxu0 %v750_v7 }
  0x24   : > { %649 = vmatpush3.bf16.msra.mxu0 %v750_v7 }
  0x25   : > { %650 = vmatprep.subr.bf16.mxu0 %v751_v8 }
  0x28   : > { %651 = vmatpush3.bf16.msra.mxu0 %v751_v8 }
  0x2b   : > { %653 = vmatmul.mubr.bf16.vlgmr.msra.gmra.mrb[0].mxu0 %v753_v9 }
  0xfe   : > { %v654_v11 = vpop.f32.mrb[0].mxu0 }
  0xff   : > { %v323_v12 = vadd.f32 %v654_v11, %v587_v10  ;;  %v314_v13 = vpop.f32.mrb[1].mxu0 }
 0x100   : > { %v315_v14 = vadd.f32 %v587_v10, %v314_v13  ;;  %v655_v15 = vpop.f32.mrb[2].mxu0 }
 0x101   : > { %v331_v16 = vmax.f32 %v323_v12, 0.0  ;;  %v326_v17 = vadd.f32 %v655_v15, %v587_v10  ;;  %v317_v18 = vpop.f32.mrb[3].mxu0 }
 0x102   : > { %v329_v19 = vmax.f32 %v315_v14, 0.0  ;;  %v318_v20 = vadd.f32 %v587_v10, %v317_v18  ;;  %360 = sbr.rel (!%p887_p4) target bundleno = 318 (0x13e), region = 36 }
 0x103   : > { %v621_v21 = vpack.c.bf16 %v331_v16, %v331_v16  ;;  %v332_v22 = vmax.f32 %v326_v17, 0.0 }
 0x104   : > { %v619_v23 = vpack.c.bf16 %v329_v19, %v329_v19  ;;  %v330_v24 = vmax.f32 %v318_v20, 0.0 }
 0x105   : > { %352 = vst.msk [vmem:[%s927_s12 + $0x8] sm:$0xf] %vm349_vm0, %v621_v21  ;;  %v622_v25 = vpack.c.bf16 %v332_v22, %v332_v22 }
 0x106   : > { %350 = vst.msk [vmem:[%s927_s12] sm:$0xf] %vm349_vm0, %v619_v23  ;;  %v620_v26 = vpack.c.bf16 %v330_v24, %v330_v24 }
 0x107   : > { %353 = vst.msk [vmem:[%s927_s12 + $0xc] sm:$0xf] %vm349_vm0, %v622_v25 }
 0x108   : > { %351 = vst.msk [vmem:[%s927_s12 + $0x4] sm:$0xf] %vm349_vm0, %v620_v26 }
 0x109   : > { %s1001_s27 = smov (!%p363_p8, %s362_s27), 4 }
 0x10a   : > { %s604_s5 = sshll.u32 %s1001_s27, 6 }
 0x10b   : > { %p607_p9 = scmp.eq.s32.totalorder %s604_s5, 0 }
 0x10c   : > { %s946_s6 = sshrl.u32 (!%p607_p9), %s1001_s27, 2 }
 0x10d   : > { %371 = sbr.rel (%p607_p9) target bundleno = 318 (0x13e), region = 40  ;;  %p608_p10 = scmp.le.s32.totalorder (!%p607_p9), %s946_s6, 0 }
 0x114   : > { %536 = sbr.rel (%p608_p10) target bundleno = 297 (0x129), region = 112  ;;  %s994_s15 = smov (!%p608_p10), %s940_s4 }
 0x115   : > { %s995_s20 = smov (!%p608_p10), %s927_s12  ;;  %s955_s23 = smov (!%p608_p10), 0  }
 0x116   : > { %s822_s7 = smov (!%p608_p10), 0  }
 0x11b LB: >> { %v387_v27 = vld [vmem:[%s816_s20] sm:$0xf]  ;;  %v389_v28 = vld [vmem:[%s816_s20 + $0x4] sm:$0xf]  ;;  %v391_v29 = vld [vmem:[%s816_s20 + $0x8] sm:$0xf]  ;;  %s824_s7 = sphi %s822_s7, %s381_s7   ;;  %s820_s23 = sphi %s955_s23, %s996_s23   ;;  %s816_s20 = sphi %s995_s20, %s400_s20   ;;  %s812_s15 = sphi %s994_s15, %s401_s15  }
 0x11c   : >> { %388 = vst [vmem:[%s812_s15] sm:$0xf] %v387_v27  ;;  %390 = vst [vmem:[%s812_s15 + $0x4] sm:$0xf] %v389_v28  ;;  %v393_v30 = vld [vmem:[%s816_s20 + $0xc] sm:$0xf]  ;;  %s395_s8 = sadd.s32 1, %s820_s23 }
 0x11d   : >> { %392 = vst [vmem:[%s812_s15 + $0x8] sm:$0xf] %v391_v29  ;;  %394 = vst [vmem:[%s812_s15 + $0xc] sm:$0xf] %v393_v30  ;;  %p396_p11 = scmp.ge.s32.totalorder %s395_s8, %s946_s6  ;;  %s381_s7 = sadd.s32 1, %s824_s7  }
 0x11e   : >> { %p380_p12 = scmp.ge.s32.totalorder %s381_s7, %s946_s6 }
 0x11f   : >> { %s1003_s8 = smov (%p396_p11, %s395_s8), 0 }
 0x120   : >> { %s609_s9 = sshll.u32 %s1003_s8, 4  ;;  %s996_s23 = smov %s1003_s8 }
 0x121   : >> { %s400_s20 = scalar_lea.vmem %s927_s12, %s609_s9 [#allocation2]   ;;  %s401_s15 = scalar_lea.vmem %s940_s4, %s609_s9  }
 0x122   : > { %383 = sbr.rel (!%p380_p12) target bundleno = 283 (0x11b), region = 118 }
 0x129 PF: > { %s971_s10 = sand.u32 3, %s1001_s27   ;;  %s624_s11 = sshll.u32 %s946_s6, 4 }
 0x12a   : > { %s406_s14 = scalar_lea.vmem %s927_s12, %s624_s11 [#allocation2]   ;;  %s408_s17 = scalar_lea.vmem %s940_s4, %s624_s11  }
 0x12b   : > { %p614_p13 = scmp.le.s32.totalorder %s971_s10, 0 }
 0x12c   : > { %s826_s18 = smov (!%p614_p13), %s408_s17   ;;  %s830_s21 = smov (!%p614_p13), %s406_s14  }
 0x12d   : > { %550 = sbr.rel (%p614_p13) target bundleno = 318 (0x13e), region = 123  ;;  %s834_s22 = smov (!%p614_p13), 0  }
 0x12e   : > { %s838_s24 = smov (!%p614_p13), 0  }
 0x134 LB: >> { %v418_v31 = vld [vmem:[%s832_s21] sm:$0xf]  ;;  %s420_s25 = sadd.s32 1, %s836_s22  ;;  %s412_s24 = sadd.s32 1, %s840_s24   ;;  %s840_s24 = sphi %s838_s24, %s412_s24   ;;  %s836_s22 = sphi %s834_s22, %s835_s22   ;;  %s832_s21 = sphi %s830_s21, %s425_s21   ;;  %s828_s18 = sphi %s826_s18, %s426_s18  }
 0x135   : >> { %419 = vst [vmem:[%s828_s18] sm:$0xf] %v418_v31  ;;  %p421_p0 = scmp.ge.s32.totalorder %s420_s25, %s971_s10  ;;  %p411_p1 = scmp.ge.s32.totalorder %s412_s24, %s971_s10 }
 0x137   : >> { %s1005_s25 = smov (%p421_p0, %s420_s25), 0  ;;  %414 = sbr.rel (!%p411_p1) target bundleno = 308 (0x134), region = 129 }
 0x138   : >> { %s615_s26 = sshll.u32 %s1005_s25, 2  ;;  %s835_s22 = smov %s1005_s25  }
 0x139   : >> { %s425_s21 = scalar_lea.vmem %s406_s14, %s615_s26 [#allocation2]   ;;  %s426_s18 = scalar_lea.vmem %s408_s17, %s615_s26  }
 0x13e PF: > { %p10_p2 = scmp.ge.s32.totalorder %s877_s16, 4   ;;  %s997_s12 = smov %s804_s13 }
 0x13f   : > { %s998_s13 = smov %s885_s19  ;;  %s999_s14 = smov %s877_s16 }
 0x140   :  { %12 = sbr.rel (!%p10_p2) target bundleno = 2 (0x2), region = 140 }

// kernel: vqvae_forward.31
= control target key start
LH: loop header
LB: loop body
LE: loop exit
PB: predicated region body
PF: predicated region fallthrough
CT: control target
= control target key end

     0   :  { %s924_s12 = smov 0   ;;  %s926_s13 = smov 0   ;;  %s1066_s0 = inlined_call_operand.vmem [shape: bf16[162,64], index: 0, kind: input, shape index: {}]   ;;  %s1067_s1 = inlined_call_operand.vmem [shape: bf16[64,12], index: 1, kind: input, shape index: {}]   ;;  %s1068_s2 = inlined_call_operand.vmem [shape: f32[1,12], index: 2, kind: input, shape index: {}]   ;;  %s1069_s3 = inlined_call_operand.vmem [shape: f32[162,12], index: 3, kind: output, shape index: {}]  }
   0x1   :  { %s928_s14 = smov 0  }
   0x2 LB: > { %s937_s15 = sadd.s32 4294967295, %s870_s14   ;;  %s939_s16 = sadd.s32 1, %s870_s14   ;;  %s870_s14 = sphi %s928_s14, %s1076_s14   ;;  %s866_s13 = sphi %s926_s13, %s1075_s13   ;;  %s862_s12 = sphi %s924_s12, %s1074_s12  }
   0x3   : > { %s85_s17 = ssub.s32 %s870_s14, %s939_s16  ;;  %s88_s18 = sadd.s32 1, %s866_s13 }
   0x4   : > { %p86_p0 = scmp.eq.s32.totalorder %s85_s17, 0  ;;  %p98_p1 = scmp.ne.s32.totalorder %s866_s13, %s862_s12 }
   0x5   : > { %p99_p2 = scmp.eq.s32.totalorder %s937_s15, 1  ;;  %p642_p3 = scmp.ge.s32.totalorder %s870_s14, 1 }
   0x6   : > { %s947_s19 = scalar_select %p86_p0, %s866_s13, %s88_s18  }
   0x7   : > { %p949_p4 = por %p99_p2, %p98_p1  ;;  %p146_p5 = scmp.lt.s32.totalorder %s870_s14, 3 }
   0x9   : > { %p147_p6 = pnand %p642_p3, %p146_p5 }
   0xa   : > { %v802_v0 = vld [vmem:[%s1067_s1] sm:$0xff] (!%p147_p6)   ;;  %s957_s23 = smul.u32 (!%p147_p6), 11, %s937_s15  ;;  %v803_v1 = vld [vmem:[%s1067_s1 + $0x8] sm:$0xff] (!%p147_p6)   ;;  %v804_v2 = vld [vmem:[%s1067_s1 + $0x10] sm:$0xff] (!%p147_p6)   ;;  %vm271_vm0 = vcmask (!%p147_p6), 523264   ;;  %s170_s8 = sand.u32 (!%p147_p6), 1, %s862_s12  }
   0xb   : > { %150 = sbr.rel (%p147_p6) target bundleno = 314 (0x13a), region = 32  ;;  %704 = vmatprep.subr.bf16.mxu1 (!%p147_p6), %v802_v0  ;;  %684 = vmatprep.subr.bf16.mxu0 (!%p147_p6), %v802_v0  ;;  %v805_v3 = vld [vmem:[%s1067_s1 + $0x18] sm:$0xff] (!%p147_p6)   ;;  %v644_v10 = vld [vmem:[%s1068_s2] ss:$0 sm:$0xff] (!%p147_p6)  ;;  %vm370_vm1 = vcmask (!%p147_p6), 97280  }
   0xc   : > { %p178_p7 = scmp.lt.s32.totalorder (!%p147_p6), %s957_s23, 20  ;;  %708 = vmatpush3.bf16.msra.mxu1 (!%p147_p6), %v802_v0  ;;  %685 = vmatpush3.bf16.msra.mxu0 (!%p147_p6), %v802_v0  ;;  %s712_s9 = smul.u32 (!%p147_p6), 88, %s170_s8 }
   0xd   : > { %705 = vmatprep.subr.bf16.mxu1 (!%p147_p6), %v803_v1  ;;  %686 = vmatprep.subr.bf16.mxu0 (!%p147_p6), %v803_v1 }
   0xe   : > { %s983_s14 = scalar_lea.vmem (!%p147_p6), [#allocation2], %s712_s9  }
  0x10   : > { %709 = vmatpush3.bf16.msra.mxu1 (!%p147_p6), %v803_v1  ;;  %687 = vmatpush3.bf16.msra.mxu0 (!%p147_p6), %v803_v1 }
  0x11   : > { %706 = vmatprep.subr.bf16.mxu1 (!%p147_p6), %v804_v2  ;;  %688 = vmatprep.subr.bf16.mxu0 (!%p147_p6), %v804_v2 }
  0x12   : > { %s179_s28 = scalar_select %p178_p7, %s957_s23, 20 }
  0x13   : > { %s390_s12 = ssub.s32 (%p949_p4), 21, %s957_s23  ;;  %s673_s17 = smul.u32 (%p949_p4), 88, %s937_s15 }
  0x14   : > { %s643_s29 = sshll.u32 %s179_s28, 2  ;;  %710 = vmatpush3.bf16.msra.mxu1 %v804_v2  ;;  %689 = vmatpush3.bf16.msra.mxu0 %v804_v2  ;;  %p391_p8 = scmp.lt.s32.totalorder (%p949_p4), %s390_s12, 11 }
  0x15   : > { %s181_s7 = scalar_lea.vmem %s1066_s0, %s643_s29  ;;  %707 = vmatprep.subr.bf16.mxu1 %v805_v3  ;;  %690 = vmatprep.subr.bf16.mxu0 %v805_v3  ;;  %s1014_s22 = scalar_lea.vmem (%p949_p4), %s1069_s3, %s673_s17  }
  0x16   : > { %v806_v4 = vld [vmem:[%s181_s7 + $0x10] sm:$0xff]   ;;  %v808_v5 = vld [vmem:[%s181_s7] sm:$0xff]   ;;  %v807_v6 = vld [vmem:[%s181_s7 + $0x18] sm:$0xff]  }
  0x17   : > { %696 = vmatprep.mubr.msk.bf16.mxu1 %vm271_vm0, %v806_v4  ;;  %692 = vmatprep.mubr.msk.bf16.mxu0 %vm271_vm0, %v808_v5  ;;  %v809_v7 = vld [vmem:[%s181_s7 + $0x8] sm:$0xff]   ;;  %v810_v8 = vld [vmem:[%s181_s7 + $0x20] sm:$0xff]  }
  0x18   : > { %711 = vmatpush3.bf16.msra.mxu1 %v805_v3  ;;  %691 = vmatpush3.bf16.msra.mxu0 %v805_v3  ;;  %v811_v9 = vld [vmem:[%s181_s7 + $0x28] ss:$0 sps:$4 sm:$0xff]  }
  0x1b   : > { %697 = vmatmul.mubr.msk.bf16.vlgmr.msra.gmra.mrb[0].mxu1 %vm271_vm0, %v807_v6  ;;  %693 = vmatmul.mubr.msk.bf16.vlgmr.msra.gmra.mrb[0].mxu0 %vm271_vm0, %v809_v7 }
  0x1c   : > { %700 = vmatprep.mubr.msk.bf16.mxu1 %vm271_vm0, %v810_v8 }
  0x23   : > { %701 = vmatmul.mubr.msk.bf16.gmra.mrb[4].mxu1 %vm271_vm0, %v811_v9 }
  0xee   : > { %v698_v11 = vpop.f32.mrb[0].mxu1  ;;  %v694_v12 = vpop.f32.mrb[0].mxu0 }
  0xef   : > { %v349_v13 = vadd.f32 %v698_v11, %v644_v10  ;;  %v340_v14 = vpop.f32.mrb[1].mxu1  ;;  %v333_v15 = vadd.f32 %v694_v12, %v644_v10  ;;  %v324_v16 = vpop.f32.mrb[1].mxu0 }
  0xf0   : > { %v341_v17 = vadd.f32 %v644_v10, %v340_v14  ;;  %v699_v18 = vpop.f32.mrb[2].mxu1  ;;  %v325_v19 = vadd.f32 %v644_v10, %v324_v16  ;;  %v695_v20 = vpop.f32.mrb[2].mxu0 }
  0xf1   : > { %377 = vst.msk [vmem:[%s983_s14 + $0x30] sm:$0xff] %vm370_vm1, %v349_v13  ;;  %v352_v21 = vadd.f32 %v699_v18, %v644_v10  ;;  %v343_v22 = vpop.f32.mrb[3].mxu1  ;;  %373 = vst.msk [vmem:[%s983_s14 + $0x10] sm:$0xff] %vm370_vm1, %v333_v15  ;;  %v336_v23 = vadd.f32 %v695_v20, %v644_v10  ;;  %v327_v24 = vpop.f32.mrb[3].mxu0 }
  0xf2   : > { %375 = vst.msk [vmem:[%s983_s14 + $0x20] sm:$0xff] %vm370_vm1, %v341_v17  ;;  %v344_v25 = vadd.f32 %v644_v10, %v343_v22  ;;  %371 = vst.msk [vmem:[%s983_s14] sm:$0xff] %vm370_vm1, %v325_v19  ;;  %v328_v26 = vadd.f32 %v644_v10, %v327_v24 }
  0xf3   : > { %378 = vst.msk [vmem:[%s983_s14 + $0x38] sm:$0xff] %vm370_vm1, %v352_v21  ;;  %374 = vst.msk [vmem:[%s983_s14 + $0x18] sm:$0xff] %vm370_vm1, %v336_v23 }
  0xf4   : > { %376 = vst.msk [vmem:[%s983_s14 + $0x28] sm:$0xff] %vm370_vm1, %v344_v25  ;;  %372 = vst.msk [vmem:[%s983_s14 + $0x8] sm:$0xff] %vm370_vm1, %v328_v26 }
  0xf6   : > { %v702_v27 = vpop.f32.mrb[4].mxu1  ;;  %388 = sbr.rel (!%p949_p4) target bundleno = 314 (0x13a), region = 36 }
  0xf7   : > { %v365_v28 = vadd.f32 %v702_v27, %v644_v10  ;;  %v356_v29 = vpop.f32.mrb[5].mxu1 }
  0xf8   : > { %v357_v30 = vadd.f32 %v644_v10, %v356_v29  ;;  %v703_v31 = vpop.f32.mrb[6].mxu1 }
  0xf9   : > { %381 = vst.msk [vmem:[%s983_s14 + $0x50] sm:$0xff] %vm370_vm1, %v365_v28  ;;  %v359_v32 = vpop.f32.mrb[7].mxu1 }
  0xfa   : > { %379 = vst.msk [vmem:[%s983_s14 + $0x40] sm:$0xff] %vm370_vm1, %v357_v30  ;;  %v360_v33 = vadd.f32 %v644_v10, %v359_v32 }
  0xfc   : > { %380 = vst.msk [vmem:[%s983_s14 + $0x48] sm:$0xff] %vm370_vm1, %v360_v33 }
  0xfd   : > { %s1078_s12 = smov (!%p391_p8, %s390_s12), 11 }
  0xfe   : > { %s661_s24 = sshll.u32 %s1078_s12, 7 }
  0xff   : > { %p664_p9 = scmp.eq.s32.totalorder %s661_s24, 0 }
 0x100   : > { %812 = sdivrem.u32 (!%p664_p9), %s1078_s12, 11 }
 0x101   : > { %399 = sbr.rel (%p664_p9) target bundleno = 314 (0x13a), region = 40 }
 0x109   : > { %s1020_s20 = spop.drf %812 }
 0x10a   : > { %p665_p10 = scmp.le.s32.totalorder %s1020_s20, 0 }
 0x10b   : > { %s1071_s15 = smov (!%p665_p10), %s1014_s22  ;;  %s1072_s23 = smov (!%p665_p10), %s983_s14 }
 0x10c   : > { %595 = sbr.rel (%p665_p10) target bundleno = 285 (0x11d), region = 116  ;;  %s1029_s25 = smov (!%p665_p10), 0  }
 0x10d   : > { %s1031_s26 = smov (!%p665_p10), 0  }
 0x113 LB: >> { %v483_v34 = vld [vmem:[%s878_s23] sm:$0xff]  ;;  %v485_v35 = vld [vmem:[%s878_s23 + $0x8] sm:$0xff]  ;;  %v487_v36 = vld [vmem:[%s878_s23 + $0x10] sm:$0xff]  ;;  %s505_s27 = sadd.s32 1, %s882_s25  ;;  %s477_s26 = sadd.s32 1, %s886_s26   ;;  %s886_s26 = sphi %s1031_s26, %s477_s26   ;;  %s882_s25 = sphi %s1029_s25, %s1073_s25   ;;  %s878_s23 = sphi %s1072_s23, %s510_s23   ;;  %s874_s15 = sphi %s1071_s15, %s511_s15  }
 0x114   : >> { %484 = vst [vmem:[%s874_s15] sm:$0xff] %v483_v34  ;;  %486 = vst [vmem:[%s874_s15 + $0x8] sm:$0xff] %v485_v35  ;;  %v489_v37 = vld [vmem:[%s878_s23 + $0x18] sm:$0xff]  ;;  %v491_v38 = vld [vmem:[%s878_s23 + $0x20] sm:$0xff]  ;;  %p506_p11 = scmp.ge.s32.totalorder %s505_s27, %s1020_s20  ;;  %p476_p12 = scmp.ge.s32.totalorder %s477_s26, %s1020_s20 }
 0x115   : >> { %488 = vst [vmem:[%s874_s15 + $0x10] sm:$0xff] %v487_v36  ;;  %v493_v39 = vld [vmem:[%s878_s23 + $0x28] sm:$0xff]  ;;  %490 = vst [vmem:[%s874_s15 + $0x18] sm:$0xff] %v489_v37  ;;  %v495_v40 = vld [vmem:[%s878_s23 + $0x30] sm:$0xff] }
 0x116   : >> { %492 = vst [vmem:[%s874_s15 + $0x20] sm:$0xff] %v491_v38  ;;  %494 = vst [vmem:[%s874_s15 + $0x28] sm:$0xff] %v493_v39  ;;  %v497_v41 = vld [vmem:[%s878_s23 + $0x38] sm:$0xff]  ;;  %v499_v42 = vld [vmem:[%s878_s23 + $0x40] sm:$0xff]  ;;  %s1080_s27 = smov (%p506_p11, %s505_s27), 0  ;;  %479 = sbr.rel (!%p476_p12) target bundleno = 275 (0x113), region = 122 }
 0x117   : >> { %496 = vst [vmem:[%s874_s15 + $0x30] sm:$0xff] %v495_v40  ;;  %498 = vst [vmem:[%s874_s15 + $0x38] sm:$0xff] %v497_v41  ;;  %v501_v43 = vld [vmem:[%s878_s23 + $0x48] sm:$0xff]  ;;  %v503_v44 = vld [vmem:[%s878_s23 + $0x50] sm:$0xff]  ;;  %s508_s28 = smul.u32 88, %s1080_s27  ;;  %s1073_s25 = smov %s1080_s27 }
 0x118   : >> { %500 = vst [vmem:[%s874_s15 + $0x40] sm:$0xff] %v499_v42  ;;  %502 = vst [vmem:[%s874_s15 + $0x48] sm:$0xff] %v501_v43 }
 0x119   : >> { %504 = vst [vmem:[%s874_s15 + $0x50] sm:$0xff] %v503_v44  ;;  %s510_s23 = scalar_lea.vmem %s983_s14, %s508_s28 [#allocation2]   ;;  %s511_s15 = scalar_lea.vmem %s1014_s22, %s508_s28  }
 0x11d PF: > { %814 = sdivrem.u32 %s1078_s12, 11 }
 0x11e   : > { %s666_s29 = smul.u32 88, %s1020_s20 }
 0x120   : > { %s516_s30 = scalar_lea.vmem %s983_s14, %s666_s29 [#allocation2]   ;;  %s518_s4 = scalar_lea.vmem %s1014_s22, %s666_s29  }
 0x126   : > { %s815_s5 = spop.drf %814 }
 0x127   : > { %p668_p13 = scmp.le.s32.totalorder %s815_s5, 0 }
 0x128   : > { %s888_s6 = smov (!%p668_p13), %s518_s4   ;;  %s892_s7 = smov (!%p668_p13), %s516_s30  }
 0x129   : > { %609 = sbr.rel (%p668_p13) target bundleno = 314 (0x13a), region = 127  ;;  %s896_s8 = smov (!%p668_p13), 0  }
 0x12a   : > { %s900_s9 = smov (!%p668_p13), 0  }
 0x130 LB: >> { %v528_v45 = vld [vmem:[%s894_s7] sm:$0xff]  ;;  %s530_s10 = sadd.s32 1, %s898_s8  ;;  %s522_s9 = sadd.s32 1, %s902_s9   ;;  %s902_s9 = sphi %s900_s9, %s522_s9   ;;  %s898_s8 = sphi %s896_s8, %s897_s8   ;;  %s894_s7 = sphi %s892_s7, %s535_s7   ;;  %s890_s6 = sphi %s888_s6, %s536_s6  }
 0x131   : >> { %529 = vst [vmem:[%s890_s6] sm:$0xff] %v528_v45  ;;  %p531_p0 = scmp.ge.s32.totalorder %s530_s10, %s815_s5  ;;  %p521_p1 = scmp.ge.s32.totalorder %s522_s9, %s815_s5 }
 0x133   : >> { %s1082_s10 = smov (%p531_p0, %s530_s10), 0  ;;  %524 = sbr.rel (!%p521_p1) target bundleno = 304 (0x130), region = 133 }
 0x134   : >> { %s669_s11 = sshll.u32 %s1082_s10, 3  ;;  %s897_s8 = smov %s1082_s10  }
 0x135   : >> { %s535_s7 = scalar_lea.vmem %s516_s30, %s669_s11 [#allocation2]   ;;  %s536_s6 = scalar_lea.vmem %s518_s4, %s669_s11  }
 0x13a PF: > { %p10_p2 = scmp.ge.s32.totalorder %s939_s16, 4   ;;  %s1074_s12 = smov %s866_s13 }
 0x13b   : > { %s1075_s13 = smov %s947_s19  ;;  %s1076_s14 = smov %s939_s16 }
 0x13c   :  { %12 = sbr.rel (!%p10_p2) target bundleno = 2 (0x2), region = 144 }

</bundles_post_ra>
